<compile_context>
chip_gen: v6e
topology: v6e:2x2x1
jax: 0.10.0
libtpu: 0.0.40
codegen_flags: <defaults>
</compile_context>

<pallas_src>
import functools

import jax
import jax.numpy as jnp
from jax import lax
from jax.experimental import pallas as pl
from jax.experimental.pallas import tpu as pltpu

LN_EPS = 1e-5  # nn.LayerNorm default


def _layernorm(x, gamma, beta):
    mean = jnp.mean(x, axis=-1, keepdims=True)
    var = jnp.mean((x - mean) ** 2, axis=-1, keepdims=True)
    return (x - mean) * lax.rsqrt(var + LN_EPS) * gamma + beta


def _encoder_layer_kernel(x_ref,
                          g1_ref, b1_ref, wqkv_ref, wout_ref, bout_ref,
                          g2_ref, b2_ref, w1_ref, bm1_ref, w2_ref, bm2_ref,
                          o_ref, attn_scratch, *, n_heads, n_valid):
    Bt, N, D = x_ref.shape
    hd = D // n_heads

    # Merge (Bt, N) -> Bt*N rows (free: N is padded to a multiple of 8).
    x2 = x_ref[...].reshape(Bt * N, D)                        # f32

    # ---------------- Multi-head attention (pre-norm) ----------------
    xn = _layernorm(x2, g1_ref[...], b1_ref[...]).astype(jnp.bfloat16)
    # Attention scale is pre-folded into the Q columns of w_qkv (see prepare_params).
    qkv = jnp.dot(xn, wqkv_ref[...], preferred_element_type=jnp.float32)   # (Bt*N, 3D) f32
    qkv = qkv.astype(jnp.bfloat16).reshape(Bt, N, 3 * D)

    if n_valid < N:  # static branch: key mask for padded tokens
        key_mask = lax.broadcasted_iota(jnp.int32, (1, 1, N), 2) < n_valid

    for h in range(n_heads):                                  # n_heads static -> unrolled
        lo = h * hd
        qh = qkv[:, :, lo:lo + hd]                            # (Bt, N, hd) bf16 (pre-scaled)
        kh = qkv[:, :, D + lo:D + lo + hd]                    # (Bt, N, hd) bf16
        vh = qkv[:, :, 2 * D + lo:2 * D + lo + hd]            # (Bt, N, hd) bf16

        # q . k^T without an explicit transpose (contract last dims, batch over Bt).
        dots = lax.dot_general(qh, kh, (((2,), (2,)), ((0,), (0,))),
                               preferred_element_type=jnp.float32)          # (Bt, N, N)
        if n_valid < N:
            dots = jnp.where(key_mask, dots, -1e30)
        dots = dots - jnp.max(dots, axis=-1, keepdims=True)
        e = jnp.exp(dots)
        recip = pl.reciprocal(jnp.sum(e, axis=-1, keepdims=True), approx=True)  # (Bt,N,1)

        # PV matmul on un-normalized probabilities; normalize afterwards over (N, hd)
        # instead of (N, N) -- ~N/hd fewer VPU multiplies per row.
        outh = lax.dot_general(e.astype(jnp.bfloat16), vh, (((2,), (1,)), ((0,), (0,))),
                               preferred_element_type=jnp.float32)          # (Bt, N, hd)
        attn_scratch[:, :, lo:lo + hd] = (outh * recip).astype(jnp.bfloat16)

    # Single D-wide output projection (full MXU contraction width).
    attn_out = jnp.dot(attn_scratch[...].reshape(Bt * N, D), wout_ref[...],
                       preferred_element_type=jnp.float32)   # (Bt*N, D) f32
    x2 = x2 + attn_out + bout_ref[...]                        # residual (f32)

    # ---------------- MLP (pre-norm) ----------------
    xn = _layernorm(x2, g2_ref[...], b2_ref[...]).astype(jnp.bfloat16)
    h1 = jnp.dot(xn, w1_ref[...], preferred_element_type=jnp.float32) + bm1_ref[...]
    # Exact GELU (PyTorch nn.GELU default, erf form), kept in f32 for accuracy.
    h1 = 0.5 * h1 * (1.0 + lax.erf(h1 * (2.0 ** -0.5)))
    out = jnp.dot(h1.astype(jnp.bfloat16), w2_ref[...],
                  preferred_element_type=jnp.float32) + bm2_ref[...]

    o_ref[...] = (x2 + out).reshape(Bt, N, D)


def _tpu_vmem_capacity():
    try:
        return int(pltpu.get_tpu_info().vmem_capacity_bytes)
    except Exception:
        return 128 << 20  # conservative default (v5e/v6e class)


def _vmem_bytes_estimate(Bt, N, D, Hm, n_heads, weight_bufs):
    """Rough upper bound on live VMEM for one grid step."""
    rows = Bt * N
    hd = D // n_heads
    weights = weight_bufs * 2 * (3 * D * D + D * D + 2 * D * Hm)     # bf16 weight blocks
    small = weight_bufs * 4 * (6 * D + Hm)                           # f32 ln params / biases
    io = 2 * 2 * 4 * rows * D                                        # double-buffered x/out (f32)
    scratch = 2 * rows * D                                           # bf16 head-concat scratch
    # In-flight values: x2 + residual (f32), qkv (bf16), up to ~4 simultaneously-live
    # (Bt,N,N) f32 score tiles from the unrolled head loop, outh, and the MLP hidden.
    interm = (4 * rows * 2 * D + 2 * rows * 3 * D
              + 4 * Bt * N * N * 4 + 4 * rows * hd + 4 * rows * Hm)
    return weights + small + io + scratch + interm


def _pick_bt(B, N, D, Hm, n_heads, vmem_budget, need_even_grid, weight_bufs):
    """Batch elements per grid step: largest that fits the VMEM budget, targeting
    Bt*N ~ 1024 rows; on dual-TC chips keep an even grid count >= 2."""
    target_rows = 1024
    best = 1
    for bt in range(1, B + 1):
        if B % bt:
            continue
        steps = B // bt
        if need_even_grid and B >= 2 and (steps < 2 or steps % 2):
            continue
        if _vmem_bytes_estimate(bt, N, D, Hm, n_heads, weight_bufs) > vmem_budget:
            continue
        best = bt
        if bt * N >= target_rows:
            break
    return best


def encoder_layer(x, p, n_heads, n_valid):
    B, N, D = x.shape  # N already padded to a multiple of 8
    Hm = p["w1"].shape[1]

    vmem_cap = _tpu_vmem_capacity()
    small_vmem = vmem_cap <= (80 << 20)          # v7x-class: 64 MiB / TensorCore, 2 TCs
    budget_cap = (50 << 20) if small_vmem else (100 << 20)
    weight_bufs = 1 if small_vmem else 2

    Bt = _pick_bt(B, N, D, Hm, n_heads, budget_cap,
                  need_even_grid=small_vmem, weight_bufs=weight_bufs)
    est = _vmem_bytes_estimate(Bt, N, D, Hm, n_heads, weight_bufs)
    vmem_limit = int(min(max(est + (8 << 20), 32 << 20), budget_cap))

    def wspec(shape):
        # Grid-invariant weight / bias blocks. On small-VMEM chips request a single
        # buffer (no point double-buffering data that never changes across the grid).
        kwargs = {}
        if weight_bufs == 1:
            try:
                kwargs["pipeline_mode"] = pl.Buffered(1)
            except Exception:
                kwargs = {}
        try:
            return pl.BlockSpec(shape, lambda b: (0,) * len(shape), **kwargs)
        except TypeError:
            return pl.BlockSpec(shape, lambda b: (0,) * len(shape))

    return pl.pallas_call(
        functools.partial(_encoder_layer_kernel, n_heads=n_heads, n_valid=n_valid),
        out_shape=jax.ShapeDtypeStruct((B, N, D), jnp.float32),
        grid=(B // Bt,),
        in_specs=[
            pl.BlockSpec((Bt, N, D), lambda b: (b, 0, 0)),
            wspec((1, D)),        # ln1 gamma
            wspec((1, D)),        # ln1 beta
            wspec((D, 3 * D)),    # w_qkv  [in, out] bf16 (Q columns pre-scaled)
            wspec((D, D)),        # w_out  [in, out] bf16
            wspec((1, D)),        # b_out
            wspec((1, D)),        # ln2 gamma
            wspec((1, D)),        # ln2 beta
            wspec((D, Hm)),       # w1 [in, out] bf16
            wspec((1, Hm)),       # b1
            wspec((Hm, D)),       # w2 [in, out] bf16
            wspec((1, D)),        # b2
        ],
        out_specs=pl.BlockSpec((Bt, N, D), lambda b: (b, 0, 0)),
        scratch_shapes=[pltpu.VMEM((Bt, N, D), jnp.bfloat16)],   # head-concat buffer
        compiler_params=pltpu.CompilerParams(
            dimension_semantics=("parallel",),
            vmem_limit_bytes=vmem_limit,
        ),
    )(x, p["ln1_g"], p["ln1_b"], p["w_qkv"], p["w_out"], p["b_out"],
      p["ln2_g"], p["ln2_b"], p["w1"], p["b1"], p["w2"], p["b2"])


@functools.partial(jax.jit, static_argnames=("n_heads",))
def transformer_encoder(x, layers, n_heads):
    # Mirrors: for attn, ff in self.layers: x = attn(x) + x; x = ff(x) + x
    # (both residual adds fused inside one Pallas kernel per layer)
    B, N, D = x.shape
    pad = (-N) % 8
    if pad:  # pad tokens to a multiple of 8 (layout-friendly); padded keys are masked
        x = jnp.pad(x, ((0, 0), (0, pad), (0, 0)))
    for p in layers:
        x = encoder_layer(x, p, n_heads, n_valid=N)
    if pad:
        x = x[:, :N, :]
    return x


def init_params(key, depth, dim, hidden_dim):
    """Raw (PyTorch-equivalent) f32 parameters, weights stored as [in, out]."""
    layers = []
    for _ in range(depth):
        key, *ks = jax.random.split(key, 7)
        layers.append({
            "ln1_g": jnp.ones((1, dim), jnp.float32),
            "ln1_b": jnp.zeros((1, dim), jnp.float32),
            "w_qkv": 0.05 * jax.random.normal(ks[0], (dim, 3 * dim), jnp.float32),
            "w_out": 0.05 * jax.random.normal(ks[1], (dim, dim), jnp.float32),
            "b_out": 0.05 * jax.random.normal(ks[2], (1, dim), jnp.float32),
            "ln2_g": jnp.ones((1, dim), jnp.float32),
            "ln2_b": jnp.zeros((1, dim), jnp.float32),
            "w1": 0.05 * jax.random.normal(ks[3], (dim, hidden_dim), jnp.float32),
            "b1": 0.05 * jax.random.normal(ks[4], (1, hidden_dim), jnp.float32),
            "w2": 0.05 * jax.random.normal(ks[5], (hidden_dim, dim), jnp.float32),
            "b2": jnp.zeros((1, dim), jnp.float32),
        })
    return layers


def prepare_params(layers, n_heads):
    """Kernel-ready params: fold the attention scale into the Q columns of w_qkv (in f32,
    before the bf16 cast) and cast all matmul weights to bf16. LN params/biases stay f32."""
    prepped = []
    for p in layers:
        D = p["w_qkv"].shape[0]
        scale = (D // n_heads) ** -0.5
        w_qkv = p["w_qkv"].at[:, :D].multiply(scale)
        prepped.append({
            "ln1_g": p["ln1_g"], "ln1_b": p["ln1_b"],
            "w_qkv": w_qkv.astype(jnp.bfloat16),
            "w_out": p["w_out"].astype(jnp.bfloat16),
            "b_out": p["b_out"],
            "ln2_g": p["ln2_g"], "ln2_b": p["ln2_b"],
            "w1": p["w1"].astype(jnp.bfloat16),
            "b1": p["b1"],
            "w2": p["w2"].astype(jnp.bfloat16),
            "b2": p["b2"],
        })
    return prepped


# --- pure-JAX f32 reference (sanity check against the raw PyTorch-equivalent params) ---
def _ref_forward(x, layers, n_heads):
    for p in layers:
        B, N, D = x.shape
        hd = D // n_heads
        xn = _layernorm(x, p["ln1_g"], p["ln1_b"])
        qkv = xn @ p["w_qkv"]
        q, k, v = jnp.split(qkv, 3, axis=-1)
        q = q.reshape(B, N, n_heads, hd).transpose(0, 2, 1, 3)
        k = k.reshape(B, N, n_heads, hd).transpose(0, 2, 1, 3)
        v = v.reshape(B, N, n_heads, hd).transpose(0, 2, 1, 3)
        dots = jnp.einsum("bhnd,bhmd->bhnm", q, k) * (hd ** -0.5)
        attn = jax.nn.softmax(dots, axis=-1)
        out = jnp.einsum("bhnm,bhmd->bhnd", attn, v).transpose(0, 2, 1, 3).reshape(B, N, D)
        x = out @ p["w_out"] + p["b_out"] + x

        xn = _layernorm(x, p["ln2_g"], p["ln2_b"])
        h = xn @ p["w1"] + p["b1"]
        h = 0.5 * h * (1.0 + lax.erf(h * (2.0 ** -0.5)))
        x = h @ p["w2"] + p["b2"] + x
    return x


if __name__ == "__main__":
    B, N, D = 2, 8, 32          # batch, tokens, embedding dim (toy shapes for correctness)
    N_HEADS = 4                 # dim % n_heads == 0
    HIDDEN = 64                 # MLP hidden dim
    DEPTH = 2

    key = jax.random.PRNGKey(0)
    kx, kx2, kp = jax.random.split(key, 3)
    x = jax.random.normal(kx, (B, N, D), jnp.float32)
    raw_layers = init_params(kp, DEPTH, D, HIDDEN)
    layers = prepare_params(raw_layers, N_HEADS)

    out = transformer_encoder(x, layers, n_heads=N_HEADS)
    out = jax.block_until_ready(out)
    assert out.shape == (B, N, D)

    ref = _ref_forward(x, raw_layers, N_HEADS)
    max_err = float(jnp.max(jnp.abs(out - ref)))
    # bf16 matmul operands (f32 accumulation) + approx reciprocal -> relaxed tolerance.
    assert jnp.allclose(out, ref, atol=5e-2, rtol=5e-2), \
        f"mismatch vs reference (max abs err {max_err})"

    # Exercise the token-padding + key-mask path (N not a multiple of 8).
    N2 = 7
    x_odd = jax.random.normal(kx2, (B, N2, D), jnp.float32)
    out_odd = jax.block_until_ready(transformer_encoder(x_odd, layers, n_heads=N_HEADS))
    ref_odd = _ref_forward(x_odd, raw_layers, N_HEADS)
    max_err2 = float(jnp.max(jnp.abs(out_odd - ref_odd)))
    assert out_odd.shape == (B, N2, D)
    assert jnp.allclose(out_odd, ref_odd, atol=5e-2, rtol=5e-2), \
        f"mismatch vs reference on padded path (max abs err {max_err2})"

    print("KERNEL_OK")
</pallas_src>

<mosaic_0001>
module attributes {stable_mosaic.version = 11 : i64} {
  func.func @_encoder_layer_kernel(%arg0: i32, %arg1: memref<2x8x32xf32, #tpu.memory_space<vmem>>, %arg2: memref<1x32xf32, #tpu.memory_space<vmem>>, %arg3: memref<1x32xf32, #tpu.memory_space<vmem>>, %arg4: memref<32x96xbf16, #tpu.memory_space<vmem>>, %arg5: memref<32x32xbf16, #tpu.memory_space<vmem>>, %arg6: memref<1x32xf32, #tpu.memory_space<vmem>>, %arg7: memref<1x32xf32, #tpu.memory_space<vmem>>, %arg8: memref<1x32xf32, #tpu.memory_space<vmem>>, %arg9: memref<32x64xbf16, #tpu.memory_space<vmem>>, %arg10: memref<1x64xf32, #tpu.memory_space<vmem>>, %arg11: memref<64x32xbf16, #tpu.memory_space<vmem>>, %arg12: memref<1x32xf32, #tpu.memory_space<vmem>>, %arg13: memref<2x8x32xf32, #tpu.memory_space<vmem>>, %arg14: memref<2x8x32xbf16, #tpu.memory_space<vmem>>) attributes {dimension_semantics = [#tpu.dimension_semantics<parallel>], iteration_bounds = array<i64: 1>, scalar_prefetch = 0 : i64, scratch_operands = 1 : i64, tpu.core_type = #tpu.core_type<tc>, window_params = [{transform_indices = @transform_0, window_bounds = array<i64: 2, 8, 32>}, {pipeline_mode = #tpu.pipeline_mode<synchronous>, transform_indices = @transform_1, window_bounds = array<i64: 1, 32>}, {pipeline_mode = #tpu.pipeline_mode<synchronous>, transform_indices = @transform_2, window_bounds = array<i64: 1, 32>}, {pipeline_mode = #tpu.pipeline_mode<synchronous>, transform_indices = @transform_3, window_bounds = array<i64: 32, 96>}, {pipeline_mode = #tpu.pipeline_mode<synchronous>, transform_indices = @transform_4, window_bounds = array<i64: 32, 32>}, {pipeline_mode = #tpu.pipeline_mode<synchronous>, transform_indices = @transform_5, window_bounds = array<i64: 1, 32>}, {pipeline_mode = #tpu.pipeline_mode<synchronous>, transform_indices = @transform_6, window_bounds = array<i64: 1, 32>}, {pipeline_mode = #tpu.pipeline_mode<synchronous>, transform_indices = @transform_7, window_bounds = array<i64: 1, 32>}, {pipeline_mode = #tpu.pipeline_mode<synchronous>, transform_indices = @transform_8, window_bounds = array<i64: 32, 64>}, {pipeline_mode = #tpu.pipeline_mode<synchronous>, transform_indices = @transform_9, window_bounds = array<i64: 1, 64>}, {pipeline_mode = #tpu.pipeline_mode<synchronous>, transform_indices = @transform_10, window_bounds = array<i64: 64, 32>}, {pipeline_mode = #tpu.pipeline_mode<synchronous>, transform_indices = @transform_11, window_bounds = array<i64: 1, 32>}, {transform_indices = @transform_12, window_bounds = array<i64: 2, 8, 32>}]} {
    %c0 = arith.constant 0 : index
    %c0_0 = arith.constant 0 : index
    %c0_1 = arith.constant 0 : index
    %0 = vector.load %arg1[%c0, %c0_0, %c0_1] : memref<2x8x32xf32, #tpu.memory_space<vmem>>, vector<2x8x32xf32>
    %1 = vector.shape_cast %0 : vector<2x8x32xf32> to vector<16x32xf32>
    %c0_2 = arith.constant 0 : index
    %c0_3 = arith.constant 0 : index
    %2 = vector.load %arg2[%c0_2, %c0_3] : memref<1x32xf32, #tpu.memory_space<vmem>>, vector<1x32xf32>
    %c0_4 = arith.constant 0 : index
    %c0_5 = arith.constant 0 : index
    %3 = vector.load %arg3[%c0_4, %c0_5] : memref<1x32xf32, #tpu.memory_space<vmem>>, vector<1x32xf32>
    %cst = arith.constant dense<0.000000e+00> : vector<16xf32>
    %4 = vector.multi_reduction <add>, %1, %cst [1] : vector<16x32xf32> to vector<16xf32>
    %5 = vector.shape_cast %4 : vector<16xf32> to vector<16x1xf32>
    %cst_6 = arith.constant 3.200000e+01 : f32
    %6 = vector.broadcast %cst_6 : f32 to vector<16x1xf32>
    %7 = arith.divf %5, %6 : vector<16x1xf32>
    %8 = vector.broadcast %7 : vector<16x1xf32> to vector<16x32xf32>
    %9 = arith.subf %1, %8 : vector<16x32xf32>
    %10 = arith.mulf %9, %9 : vector<16x32xf32>
    %cst_7 = arith.constant dense<0.000000e+00> : vector<16xf32>
    %11 = vector.multi_reduction <add>, %10, %cst_7 [1] : vector<16x32xf32> to vector<16xf32>
    %12 = vector.shape_cast %11 : vector<16xf32> to vector<16x1xf32>
    %cst_8 = arith.constant 3.200000e+01 : f32
    %13 = vector.broadcast %cst_8 : f32 to vector<16x1xf32>
    %14 = arith.divf %12, %13 : vector<16x1xf32>
    %15 = vector.broadcast %7 : vector<16x1xf32> to vector<16x32xf32>
    %16 = arith.subf %1, %15 : vector<16x32xf32>
    %cst_9 = arith.constant 9.99999974E-6 : f32
    %17 = vector.broadcast %cst_9 : f32 to vector<16x1xf32>
    %18 = arith.addf %14, %17 : vector<16x1xf32>
    %19 = math.rsqrt %18 : vector<16x1xf32>
    %20 = vector.broadcast %19 : vector<16x1xf32> to vector<16x32xf32>
    %21 = arith.mulf %16, %20 : vector<16x32xf32>
    %22 = vector.broadcast %2 : vector<1x32xf32> to vector<16x32xf32>
    %23 = arith.mulf %21, %22 : vector<16x32xf32>
    %24 = vector.broadcast %3 : vector<1x32xf32> to vector<16x32xf32>
    %25 = arith.addf %23, %24 : vector<16x32xf32>
    %26 = arith.truncf %25 : vector<16x32xf32> to vector<16x32xbf16>
    %c0_10 = arith.constant 0 : index
    %c0_11 = arith.constant 0 : index
    %27 = vector.load %arg4[%c0_10, %c0_11] : memref<32x96xbf16, #tpu.memory_space<vmem>>, vector<32x96xbf16>
    %cst_12 = arith.constant dense<0.000000e+00> : vector<16x96xf32>
    %28 = tpu.matmul %26, %27, %cst_12 {dimension_numbers = #tpu.dot_dimension_numbers<[1], [0], [0], [1], [0, 0, 1, 1], [], []>} : vector<16x32xbf16>, vector<32x96xbf16>, vector<16x96xf32> -> vector<16x96xf32>
    %29 = arith.truncf %28 : vector<16x96xf32> to vector<16x96xbf16>
    %30 = vector.shape_cast %29 : vector<16x96xbf16> to vector<2x8x96xbf16>
    %31 = vector.extract_strided_slice %30 {offsets = [0, 0, 0], sizes = [2, 8, 8], strides = [1, 1, 1]} : vector<2x8x96xbf16> to vector<2x8x8xbf16>
    %32 = vector.extract_strided_slice %30 {offsets = [0, 0, 32], sizes = [2, 8, 8], strides = [1, 1, 1]} : vector<2x8x96xbf16> to vector<2x8x8xbf16>
    %33 = vector.extract_strided_slice %30 {offsets = [0, 0, 64], sizes = [2, 8, 8], strides = [1, 1, 1]} : vector<2x8x96xbf16> to vector<2x8x8xbf16>
    %cst_13 = arith.constant dense<0.000000e+00> : vector<2x8x8xf32>
    %34 = tpu.matmul %31, %32, %cst_13 {dimension_numbers = #tpu.dot_dimension_numbers<[2], [2], [1], [1], [0, 0, 0, 1, 1, 1], [0], [0]>} : vector<2x8x8xbf16>, vector<2x8x8xbf16>, vector<2x8x8xf32> -> vector<2x8x8xf32>
    %cst_14 = arith.constant dense<0xFF800000> : vector<2x8xf32>
    %35 = vector.multi_reduction <maximumf>, %34, %cst_14 [2] : vector<2x8x8xf32> to vector<2x8xf32>
    %36 = vector.shape_cast %35 : vector<2x8xf32> to vector<2x8x1xf32>
    %37 = vector.broadcast %36 : vector<2x8x1xf32> to vector<2x8x8xf32>
    %38 = arith.subf %34, %37 : vector<2x8x8xf32>
    %39 = math.exp %38 : vector<2x8x8xf32>
    %cst_15 = arith.constant dense<0.000000e+00> : vector<2x8xf32>
    %40 = vector.multi_reduction <add>, %39, %cst_15 [2] : vector<2x8x8xf32> to vector<2x8xf32>
    %41 = vector.shape_cast %40 : vector<2x8xf32> to vector<2x8x1xf32>
    %42 = tpu.reciprocal %41 {approx = true} : vector<2x8x1xf32> -> vector<2x8x1xf32>
    %43 = arith.truncf %39 : vector<2x8x8xf32> to vector<2x8x8xbf16>
    %cst_16 = arith.constant dense<0.000000e+00> : vector<2x8x8xf32>
    %44 = tpu.matmul %43, %33, %cst_16 {dimension_numbers = #tpu.dot_dimension_numbers<[2], [1], [1], [2], [0, 0, 0, 1, 1, 2], [0], [0]>} : vector<2x8x8xbf16>, vector<2x8x8xbf16>, vector<2x8x8xf32> -> vector<2x8x8xf32>
    %45 = vector.broadcast %42 : vector<2x8x1xf32> to vector<2x8x8xf32>
    %46 = arith.mulf %44, %45 : vector<2x8x8xf32>
    %47 = arith.truncf %46 : vector<2x8x8xf32> to vector<2x8x8xbf16>
    %c0_17 = arith.constant 0 : index
    %c0_18 = arith.constant 0 : index
    %c0_19 = arith.constant 0 : index
    %48 = vector.load %arg14[%c0_17, %c0_18, %c0_19] : memref<2x8x32xbf16, #tpu.memory_space<vmem>>, vector<2x8x8xbf16>
    tpu.vector_store %arg14[%c0_17, %c0_18, %c0_19], %47 {strides = array<i32>} : memref<2x8x32xbf16, #tpu.memory_space<vmem>>, vector<2x8x8xbf16>,
    %49 = vector.extract_strided_slice %30 {offsets = [0, 0, 8], sizes = [2, 8, 8], strides = [1, 1, 1]} : vector<2x8x96xbf16> to vector<2x8x8xbf16>
    %50 = vector.extract_strided_slice %30 {offsets = [0, 0, 40], sizes = [2, 8, 8], strides = [1, 1, 1]} : vector<2x8x96xbf16> to vector<2x8x8xbf16>
    %51 = vector.extract_strided_slice %30 {offsets = [0, 0, 72], sizes = [2, 8, 8], strides = [1, 1, 1]} : vector<2x8x96xbf16> to vector<2x8x8xbf16>
    %cst_20 = arith.constant dense<0.000000e+00> : vector<2x8x8xf32>
    %52 = tpu.matmul %49, %50, %cst_20 {dimension_numbers = #tpu.dot_dimension_numbers<[2], [2], [1], [1], [0, 0, 0, 1, 1, 1], [0], [0]>} : vector<2x8x8xbf16>, vector<2x8x8xbf16>, vector<2x8x8xf32> -> vector<2x8x8xf32>
    %cst_21 = arith.constant dense<0xFF800000> : vector<2x8xf32>
    %53 = vector.multi_reduction <maximumf>, %52, %cst_21 [2] : vector<2x8x8xf32> to vector<2x8xf32>
    %54 = vector.shape_cast %53 : vector<2x8xf32> to vector<2x8x1xf32>
    %55 = vector.broadcast %54 : vector<2x8x1xf32> to vector<2x8x8xf32>
    %56 = arith.subf %52, %55 : vector<2x8x8xf32>
    %57 = math.exp %56 : vector<2x8x8xf32>
    %cst_22 = arith.constant dense<0.000000e+00> : vector<2x8xf32>
    %58 = vector.multi_reduction <add>, %57, %cst_22 [2] : vector<2x8x8xf32> to vector<2x8xf32>
    %59 = vector.shape_cast %58 : vector<2x8xf32> to vector<2x8x1xf32>
    %60 = tpu.reciprocal %59 {approx = true} : vector<2x8x1xf32> -> vector<2x8x1xf32>
    %61 = arith.truncf %57 : vector<2x8x8xf32> to vector<2x8x8xbf16>
    %cst_23 = arith.constant dense<0.000000e+00> : vector<2x8x8xf32>
    %62 = tpu.matmul %61, %51, %cst_23 {dimension_numbers = #tpu.dot_dimension_numbers<[2], [1], [1], [2], [0, 0, 0, 1, 1, 2], [0], [0]>} : vector<2x8x8xbf16>, vector<2x8x8xbf16>, vector<2x8x8xf32> -> vector<2x8x8xf32>
    %63 = vector.broadcast %60 : vector<2x8x1xf32> to vector<2x8x8xf32>
    %64 = arith.mulf %62, %63 : vector<2x8x8xf32>
    %65 = arith.truncf %64 : vector<2x8x8xf32> to vector<2x8x8xbf16>
    %c0_24 = arith.constant 0 : index
    %c0_25 = arith.constant 0 : index
    %c8 = arith.constant 8 : index
    %66 = vector.load %arg14[%c0_24, %c0_25, %c8] : memref<2x8x32xbf16, #tpu.memory_space<vmem>>, vector<2x8x8xbf16>
    tpu.vector_store %arg14[%c0_24, %c0_25, %c8], %65 {strides = array<i32>} : memref<2x8x32xbf16, #tpu.memory_space<vmem>>, vector<2x8x8xbf16>,
    %67 = vector.extract_strided_slice %30 {offsets = [0, 0, 16], sizes = [2, 8, 8], strides = [1, 1, 1]} : vector<2x8x96xbf16> to vector<2x8x8xbf16>
    %68 = vector.extract_strided_slice %30 {offsets = [0, 0, 48], sizes = [2, 8, 8], strides = [1, 1, 1]} : vector<2x8x96xbf16> to vector<2x8x8xbf16>
    %69 = vector.extract_strided_slice %30 {offsets = [0, 0, 80], sizes = [2, 8, 8], strides = [1, 1, 1]} : vector<2x8x96xbf16> to vector<2x8x8xbf16>
    %cst_26 = arith.constant dense<0.000000e+00> : vector<2x8x8xf32>
    %70 = tpu.matmul %67, %68, %cst_26 {dimension_numbers = #tpu.dot_dimension_numbers<[2], [2], [1], [1], [0, 0, 0, 1, 1, 1], [0], [0]>} : vector<2x8x8xbf16>, vector<2x8x8xbf16>, vector<2x8x8xf32> -> vector<2x8x8xf32>
    %cst_27 = arith.constant dense<0xFF800000> : vector<2x8xf32>
    %71 = vector.multi_reduction <maximumf>, %70, %cst_27 [2] : vector<2x8x8xf32> to vector<2x8xf32>
    %72 = vector.shape_cast %71 : vector<2x8xf32> to vector<2x8x1xf32>
    %73 = vector.broadcast %72 : vector<2x8x1xf32> to vector<2x8x8xf32>
    %74 = arith.subf %70, %73 : vector<2x8x8xf32>
    %75 = math.exp %74 : vector<2x8x8xf32>
    %cst_28 = arith.constant dense<0.000000e+00> : vector<2x8xf32>
    %76 = vector.multi_reduction <add>, %75, %cst_28 [2] : vector<2x8x8xf32> to vector<2x8xf32>
    %77 = vector.shape_cast %76 : vector<2x8xf32> to vector<2x8x1xf32>
    %78 = tpu.reciprocal %77 {approx = true} : vector<2x8x1xf32> -> vector<2x8x1xf32>
    %79 = arith.truncf %75 : vector<2x8x8xf32> to vector<2x8x8xbf16>
    %cst_29 = arith.constant dense<0.000000e+00> : vector<2x8x8xf32>
    %80 = tpu.matmul %79, %69, %cst_29 {dimension_numbers = #tpu.dot_dimension_numbers<[2], [1], [1], [2], [0, 0, 0, 1, 1, 2], [0], [0]>} : vector<2x8x8xbf16>, vector<2x8x8xbf16>, vector<2x8x8xf32> -> vector<2x8x8xf32>
    %81 = vector.broadcast %78 : vector<2x8x1xf32> to vector<2x8x8xf32>
    %82 = arith.mulf %80, %81 : vector<2x8x8xf32>
    %83 = arith.truncf %82 : vector<2x8x8xf32> to vector<2x8x8xbf16>
    %c0_30 = arith.constant 0 : index
    %c0_31 = arith.constant 0 : index
    %c16 = arith.constant 16 : index
    %84 = vector.load %arg14[%c0_30, %c0_31, %c16] : memref<2x8x32xbf16, #tpu.memory_space<vmem>>, vector<2x8x8xbf16>
    tpu.vector_store %arg14[%c0_30, %c0_31, %c16], %83 {strides = array<i32>} : memref<2x8x32xbf16, #tpu.memory_space<vmem>>, vector<2x8x8xbf16>,
    %85 = vector.extract_strided_slice %30 {offsets = [0, 0, 24], sizes = [2, 8, 8], strides = [1, 1, 1]} : vector<2x8x96xbf16> to vector<2x8x8xbf16>
    %86 = vector.extract_strided_slice %30 {offsets = [0, 0, 56], sizes = [2, 8, 8], strides = [1, 1, 1]} : vector<2x8x96xbf16> to vector<2x8x8xbf16>
    %87 = vector.extract_strided_slice %30 {offsets = [0, 0, 88], sizes = [2, 8, 8], strides = [1, 1, 1]} : vector<2x8x96xbf16> to vector<2x8x8xbf16>
    %cst_32 = arith.constant dense<0.000000e+00> : vector<2x8x8xf32>
    %88 = tpu.matmul %85, %86, %cst_32 {dimension_numbers = #tpu.dot_dimension_numbers<[2], [2], [1], [1], [0, 0, 0, 1, 1, 1], [0], [0]>} : vector<2x8x8xbf16>, vector<2x8x8xbf16>, vector<2x8x8xf32> -> vector<2x8x8xf32>
    %cst_33 = arith.constant dense<0xFF800000> : vector<2x8xf32>
    %89 = vector.multi_reduction <maximumf>, %88, %cst_33 [2] : vector<2x8x8xf32> to vector<2x8xf32>
    %90 = vector.shape_cast %89 : vector<2x8xf32> to vector<2x8x1xf32>
    %91 = vector.broadcast %90 : vector<2x8x1xf32> to vector<2x8x8xf32>
    %92 = arith.subf %88, %91 : vector<2x8x8xf32>
    %93 = math.exp %92 : vector<2x8x8xf32>
    %cst_34 = arith.constant dense<0.000000e+00> : vector<2x8xf32>
    %94 = vector.multi_reduction <add>, %93, %cst_34 [2] : vector<2x8x8xf32> to vector<2x8xf32>
    %95 = vector.shape_cast %94 : vector<2x8xf32> to vector<2x8x1xf32>
    %96 = tpu.reciprocal %95 {approx = true} : vector<2x8x1xf32> -> vector<2x8x1xf32>
    %97 = arith.truncf %93 : vector<2x8x8xf32> to vector<2x8x8xbf16>
    %cst_35 = arith.constant dense<0.000000e+00> : vector<2x8x8xf32>
    %98 = tpu.matmul %97, %87, %cst_35 {dimension_numbers = #tpu.dot_dimension_numbers<[2], [1], [1], [2], [0, 0, 0, 1, 1, 2], [0], [0]>} : vector<2x8x8xbf16>, vector<2x8x8xbf16>, vector<2x8x8xf32> -> vector<2x8x8xf32>
    %99 = vector.broadcast %96 : vector<2x8x1xf32> to vector<2x8x8xf32>
    %100 = arith.mulf %98, %99 : vector<2x8x8xf32>
    %101 = arith.truncf %100 : vector<2x8x8xf32> to vector<2x8x8xbf16>
    %c0_36 = arith.constant 0 : index
    %c0_37 = arith.constant 0 : index
    %c24 = arith.constant 24 : index
    %102 = vector.load %arg14[%c0_36, %c0_37, %c24] : memref<2x8x32xbf16, #tpu.memory_space<vmem>>, vector<2x8x8xbf16>
    tpu.vector_store %arg14[%c0_36, %c0_37, %c24], %101 {strides = array<i32>} : memref<2x8x32xbf16, #tpu.memory_space<vmem>>, vector<2x8x8xbf16>,
    %c0_38 = arith.constant 0 : index
    %c0_39 = arith.constant 0 : index
    %c0_40 = arith.constant 0 : index
    %103 = vector.load %arg14[%c0_38, %c0_39, %c0_40] : memref<2x8x32xbf16, #tpu.memory_space<vmem>>, vector<2x8x32xbf16>
    %104 = vector.shape_cast %103 : vector<2x8x32xbf16> to vector<16x32xbf16>
    %c0_41 = arith.constant 0 : index
    %c0_42 = arith.constant 0 : index
    %105 = vector.load %arg5[%c0_41, %c0_42] : memref<32x32xbf16, #tpu.memory_space<vmem>>, vector<32x32xbf16>
    %cst_43 = arith.constant dense<0.000000e+00> : vector<16x32xf32>
    %106 = tpu.matmul %104, %105, %cst_43 {dimension_numbers = #tpu.dot_dimension_numbers<[1], [0], [0], [1], [0, 0, 1, 1], [], []>} : vector<16x32xbf16>, vector<32x32xbf16>, vector<16x32xf32> -> vector<16x32xf32>
    %107 = arith.addf %1, %106 : vector<16x32xf32>
    %c0_44 = arith.constant 0 : index
    %c0_45 = arith.constant 0 : index
    %108 = vector.load %arg6[%c0_44, %c0_45] : memref<1x32xf32, #tpu.memory_space<vmem>>, vector<1x32xf32>
    %109 = vector.broadcast %108 : vector<1x32xf32> to vector<16x32xf32>
    %110 = arith.addf %107, %109 : vector<16x32xf32>
    %c0_46 = arith.constant 0 : index
    %c0_47 = arith.constant 0 : index
    %111 = vector.load %arg7[%c0_46, %c0_47] : memref<1x32xf32, #tpu.memory_space<vmem>>, vector<1x32xf32>
    %c0_48 = arith.constant 0 : index
    %c0_49 = arith.constant 0 : index
    %112 = vector.load %arg8[%c0_48, %c0_49] : memref<1x32xf32, #tpu.memory_space<vmem>>, vector<1x32xf32>
    %cst_50 = arith.constant dense<0.000000e+00> : vector<16xf32>
    %113 = vector.multi_reduction <add>, %110, %cst_50 [1] : vector<16x32xf32> to vector<16xf32>
    %114 = vector.shape_cast %113 : vector<16xf32> to vector<16x1xf32>
    %cst_51 = arith.constant 3.200000e+01 : f32
    %115 = vector.broadcast %cst_51 : f32 to vector<16x1xf32>
    %116 = arith.divf %114, %115 : vector<16x1xf32>
    %117 = vector.broadcast %116 : vector<16x1xf32> to vector<16x32xf32>
    %118 = arith.subf %110, %117 : vector<16x32xf32>
    %119 = arith.mulf %118, %118 : vector<16x32xf32>
    %cst_52 = arith.constant dense<0.000000e+00> : vector<16xf32>
    %120 = vector.multi_reduction <add>, %119, %cst_52 [1] : vector<16x32xf32> to vector<16xf32>
    %121 = vector.shape_cast %120 : vector<16xf32> to vector<16x1xf32>
    %cst_53 = arith.constant 3.200000e+01 : f32
    %122 = vector.broadcast %cst_53 : f32 to vector<16x1xf32>
    %123 = arith.divf %121, %122 : vector<16x1xf32>
    %124 = vector.broadcast %116 : vector<16x1xf32> to vector<16x32xf32>
    %125 = arith.subf %110, %124 : vector<16x32xf32>
    %cst_54 = arith.constant 9.99999974E-6 : f32
    %126 = vector.broadcast %cst_54 : f32 to vector<16x1xf32>
    %127 = arith.addf %123, %126 : vector<16x1xf32>
    %128 = math.rsqrt %127 : vector<16x1xf32>
    %129 = vector.broadcast %128 : vector<16x1xf32> to vector<16x32xf32>
    %130 = arith.mulf %125, %129 : vector<16x32xf32>
    %131 = vector.broadcast %111 : vector<1x32xf32> to vector<16x32xf32>
    %132 = arith.mulf %130, %131 : vector<16x32xf32>
    %133 = vector.broadcast %112 : vector<1x32xf32> to vector<16x32xf32>
    %134 = arith.addf %132, %133 : vector<16x32xf32>
    %135 = arith.truncf %134 : vector<16x32xf32> to vector<16x32xbf16>
    %c0_55 = arith.constant 0 : index
    %c0_56 = arith.constant 0 : index
    %136 = vector.load %arg9[%c0_55, %c0_56] : memref<32x64xbf16, #tpu.memory_space<vmem>>, vector<32x64xbf16>
    %cst_57 = arith.constant dense<0.000000e+00> : vector<16x64xf32>
    %137 = tpu.matmul %135, %136, %cst_57 {dimension_numbers = #tpu.dot_dimension_numbers<[1], [0], [0], [1], [0, 0, 1, 1], [], []>} : vector<16x32xbf16>, vector<32x64xbf16>, vector<16x64xf32> -> vector<16x64xf32>
    %c0_58 = arith.constant 0 : index
    %c0_59 = arith.constant 0 : index
    %138 = vector.load %arg10[%c0_58, %c0_59] : memref<1x64xf32, #tpu.memory_space<vmem>>, vector<1x64xf32>
    %139 = vector.broadcast %138 : vector<1x64xf32> to vector<16x64xf32>
    %140 = arith.addf %137, %139 : vector<16x64xf32>
    %cst_60 = arith.constant 5.000000e-01 : f32
    %141 = vector.broadcast %cst_60 : f32 to vector<16x64xf32>
    %142 = arith.mulf %141, %140 : vector<16x64xf32>
    %cst_61 = arith.constant 0.707106769 : f32
    %143 = vector.broadcast %cst_61 : f32 to vector<16x64xf32>
    %144 = arith.mulf %140, %143 : vector<16x64xf32>
    %145 = math.erf %144 : vector<16x64xf32>
    %cst_62 = arith.constant 1.000000e+00 : f32
    %146 = vector.broadcast %cst_62 : f32 to vector<16x64xf32>
    %147 = arith.addf %146, %145 : vector<16x64xf32>
    %148 = arith.mulf %142, %147 : vector<16x64xf32>
    %149 = arith.truncf %148 : vector<16x64xf32> to vector<16x64xbf16>
    %c0_63 = arith.constant 0 : index
    %c0_64 = arith.constant 0 : index
    %150 = vector.load %arg11[%c0_63, %c0_64] : memref<64x32xbf16, #tpu.memory_space<vmem>>, vector<64x32xbf16>
    %cst_65 = arith.constant dense<0.000000e+00> : vector<16x32xf32>
    %151 = tpu.matmul %149, %150, %cst_65 {dimension_numbers = #tpu.dot_dimension_numbers<[1], [0], [0], [1], [0, 0, 1, 1], [], []>} : vector<16x64xbf16>, vector<64x32xbf16>, vector<16x32xf32> -> vector<16x32xf32>
    %c0_66 = arith.constant 0 : index
    %c0_67 = arith.constant 0 : index
    %152 = vector.load %arg12[%c0_66, %c0_67] : memref<1x32xf32, #tpu.memory_space<vmem>>, vector<1x32xf32>
    %153 = vector.broadcast %152 : vector<1x32xf32> to vector<16x32xf32>
    %154 = arith.addf %151, %153 : vector<16x32xf32>
    %155 = arith.addf %110, %154 : vector<16x32xf32>
    %156 = vector.shape_cast %155 : vector<16x32xf32> to vector<2x8x32xf32>
    %c0_68 = arith.constant 0 : index
    %c0_69 = arith.constant 0 : index
    %c0_70 = arith.constant 0 : index
    %157 = vector.load %arg13[%c0_68, %c0_69, %c0_70] : memref<2x8x32xf32, #tpu.memory_space<vmem>>, vector<2x8x32xf32>
    tpu.vector_store %arg13[%c0_68, %c0_69, %c0_70], %156 {strides = array<i32>} : memref<2x8x32xf32, #tpu.memory_space<vmem>>, vector<2x8x32xf32>,
    return
  }
  func.func @transform_0(%arg0: i32) -> (i32, i32, i32) {
    %c0_i32 = arith.constant 0 : i32
    %c0_i32_0 = arith.constant 0 : i32
    %c0_i32_1 = arith.constant 0 : i32
    return %arg0, %c0_i32, %c0_i32_0 : i32, i32, i32
  }
  func.func @transform_1(%arg0: i32) -> (i32, i32) {
    %c0_i32 = arith.constant 0 : i32
    %c0_i32_0 = arith.constant 0 : i32
    %c0_i32_1 = arith.constant 0 : i32
    return %c0_i32, %c0_i32_0 : i32, i32
  }
  func.func @transform_2(%arg0: i32) -> (i32, i32) {
    %c0_i32 = arith.constant 0 : i32
    %c0_i32_0 = arith.constant 0 : i32
    %c0_i32_1 = arith.constant 0 : i32
    return %c0_i32, %c0_i32_0 : i32, i32
  }
  func.func @transform_3(%arg0: i32) -> (i32, i32) {
    %c0_i32 = arith.constant 0 : i32
    %c0_i32_0 = arith.constant 0 : i32
    %c0_i32_1 = arith.constant 0 : i32
    return %c0_i32, %c0_i32_0 : i32, i32
  }
  func.func @transform_4(%arg0: i32) -> (i32, i32) {
    %c0_i32 = arith.constant 0 : i32
    %c0_i32_0 = arith.constant 0 : i32
    %c0_i32_1 = arith.constant 0 : i32
    return %c0_i32, %c0_i32_0 : i32, i32
  }
  func.func @transform_5(%arg0: i32) -> (i32, i32) {
    %c0_i32 = arith.constant 0 : i32
    %c0_i32_0 = arith.constant 0 : i32
    %c0_i32_1 = arith.constant 0 : i32
    return %c0_i32, %c0_i32_0 : i32, i32
  }
  func.func @transform_6(%arg0: i32) -> (i32, i32) {
    %c0_i32 = arith.constant 0 : i32
    %c0_i32_0 = arith.constant 0 : i32
    %c0_i32_1 = arith.constant 0 : i32
    return %c0_i32, %c0_i32_0 : i32, i32
  }
  func.func @transform_7(%arg0: i32) -> (i32, i32) {
    %c0_i32 = arith.constant 0 : i32
    %c0_i32_0 = arith.constant 0 : i32
    %c0_i32_1 = arith.constant 0 : i32
    return %c0_i32, %c0_i32_0 : i32, i32
  }
  func.func @transform_8(%arg0: i32) -> (i32, i32) {
    %c0_i32 = arith.constant 0 : i32
    %c0_i32_0 = arith.constant 0 : i32
    %c0_i32_1 = arith.constant 0 : i32
    return %c0_i32, %c0_i32_0 : i32, i32
  }
  func.func @transform_9(%arg0: i32) -> (i32, i32) {
    %c0_i32 = arith.constant 0 : i32
    %c0_i32_0 = arith.constant 0 : i32
    %c0_i32_1 = arith.constant 0 : i32
    return %c0_i32, %c0_i32_0 : i32, i32
  }
  func.func @transform_10(%arg0: i32) -> (i32, i32) {
    %c0_i32 = arith.constant 0 : i32
    %c0_i32_0 = arith.constant 0 : i32
    %c0_i32_1 = arith.constant 0 : i32
    return %c0_i32, %c0_i32_0 : i32, i32
  }
  func.func @transform_11(%arg0: i32) -> (i32, i32) {
    %c0_i32 = arith.constant 0 : i32
    %c0_i32_0 = arith.constant 0 : i32
    %c0_i32_1 = arith.constant 0 : i32
    return %c0_i32, %c0_i32_0 : i32, i32
  }
  func.func @transform_12(%arg0: i32) -> (i32, i32, i32) {
    %c0_i32 = arith.constant 0 : i32
    %c0_i32_0 = arith.constant 0 : i32
    %c0_i32_1 = arith.constant 0 : i32
    return %arg0, %c0_i32, %c0_i32_0 : i32, i32, i32
  }
}

module attributes {stable_mosaic.version = 11 : i64} {
  func.func @_encoder_layer_kernel(%arg0: i32, %arg1: memref<2x8x32xf32, #tpu.memory_space<vmem>>, %arg2: memref<1x32xf32, #tpu.memory_space<vmem>>, %arg3: memref<1x32xf32, #tpu.memory_space<vmem>>, %arg4: memref<32x96xbf16, #tpu.memory_space<vmem>>, %arg5: memref<32x32xbf16, #tpu.memory_space<vmem>>, %arg6: memref<1x32xf32, #tpu.memory_space<vmem>>, %arg7: memref<1x32xf32, #tpu.memory_space<vmem>>, %arg8: memref<1x32xf32, #tpu.memory_space<vmem>>, %arg9: memref<32x64xbf16, #tpu.memory_space<vmem>>, %arg10: memref<1x64xf32, #tpu.memory_space<vmem>>, %arg11: memref<64x32xbf16, #tpu.memory_space<vmem>>, %arg12: memref<1x32xf32, #tpu.memory_space<vmem>>, %arg13: memref<2x8x32xf32, #tpu.memory_space<vmem>>, %arg14: memref<2x8x32xbf16, #tpu.memory_space<vmem>>) attributes {dimension_semantics = [#tpu.dimension_semantics<parallel>], iteration_bounds = array<i64: 1>, scalar_prefetch = 0 : i64, scratch_operands = 1 : i64, tpu.core_type = #tpu.core_type<tc>, window_params = [{transform_indices = @transform_0, window_bounds = array<i64: 2, 8, 32>}, {pipeline_mode = #tpu.pipeline_mode<synchronous>, transform_indices = @transform_1, window_bounds = array<i64: 1, 32>}, {pipeline_mode = #tpu.pipeline_mode<synchronous>, transform_indices = @transform_2, window_bounds = array<i64: 1, 32>}, {pipeline_mode = #tpu.pipeline_mode<synchronous>, transform_indices = @transform_3, window_bounds = array<i64: 32, 96>}, {pipeline_mode = #tpu.pipeline_mode<synchronous>, transform_indices = @transform_4, window_bounds = array<i64: 32, 32>}, {pipeline_mode = #tpu.pipeline_mode<synchronous>, transform_indices = @transform_5, window_bounds = array<i64: 1, 32>}, {pipeline_mode = #tpu.pipeline_mode<synchronous>, transform_indices = @transform_6, window_bounds = array<i64: 1, 32>}, {pipeline_mode = #tpu.pipeline_mode<synchronous>, transform_indices = @transform_7, window_bounds = array<i64: 1, 32>}, {pipeline_mode = #tpu.pipeline_mode<synchronous>, transform_indices = @transform_8, window_bounds = array<i64: 32, 64>}, {pipeline_mode = #tpu.pipeline_mode<synchronous>, transform_indices = @transform_9, window_bounds = array<i64: 1, 64>}, {pipeline_mode = #tpu.pipeline_mode<synchronous>, transform_indices = @transform_10, window_bounds = array<i64: 64, 32>}, {pipeline_mode = #tpu.pipeline_mode<synchronous>, transform_indices = @transform_11, window_bounds = array<i64: 1, 32>}, {transform_indices = @transform_12, window_bounds = array<i64: 2, 8, 32>}]} {
    %c0 = arith.constant 0 : index
    %c0_0 = arith.constant 0 : index
    %c0_1 = arith.constant 0 : index
    %0 = vector.load %arg1[%c0, %c0_0, %c0_1] : memref<2x8x32xf32, #tpu.memory_space<vmem>>, vector<2x8x32xf32>
    %1 = vector.shape_cast %0 : vector<2x8x32xf32> to vector<16x32xf32>
    %c0_2 = arith.constant 0 : index
    %c0_3 = arith.constant 0 : index
    %2 = vector.load %arg2[%c0_2, %c0_3] : memref<1x32xf32, #tpu.memory_space<vmem>>, vector<1x32xf32>
    %c0_4 = arith.constant 0 : index
    %c0_5 = arith.constant 0 : index
    %3 = vector.load %arg3[%c0_4, %c0_5] : memref<1x32xf32, #tpu.memory_space<vmem>>, vector<1x32xf32>
    %cst = arith.constant dense<0.000000e+00> : vector<16xf32>
    %4 = vector.multi_reduction <add>, %1, %cst [1] : vector<16x32xf32> to vector<16xf32>
    %5 = vector.shape_cast %4 : vector<16xf32> to vector<16x1xf32>
    %cst_6 = arith.constant 3.200000e+01 : f32
    %6 = vector.broadcast %cst_6 : f32 to vector<16x1xf32>
    %7 = arith.divf %5, %6 : vector<16x1xf32>
    %8 = vector.broadcast %7 : vector<16x1xf32> to vector<16x32xf32>
    %9 = arith.subf %1, %8 : vector<16x32xf32>
    %10 = arith.mulf %9, %9 : vector<16x32xf32>
    %cst_7 = arith.constant dense<0.000000e+00> : vector<16xf32>
    %11 = vector.multi_reduction <add>, %10, %cst_7 [1] : vector<16x32xf32> to vector<16xf32>
    %12 = vector.shape_cast %11 : vector<16xf32> to vector<16x1xf32>
    %cst_8 = arith.constant 3.200000e+01 : f32
    %13 = vector.broadcast %cst_8 : f32 to vector<16x1xf32>
    %14 = arith.divf %12, %13 : vector<16x1xf32>
    %15 = vector.broadcast %7 : vector<16x1xf32> to vector<16x32xf32>
    %16 = arith.subf %1, %15 : vector<16x32xf32>
    %cst_9 = arith.constant 9.99999974E-6 : f32
    %17 = vector.broadcast %cst_9 : f32 to vector<16x1xf32>
    %18 = arith.addf %14, %17 : vector<16x1xf32>
    %19 = math.rsqrt %18 : vector<16x1xf32>
    %20 = vector.broadcast %19 : vector<16x1xf32> to vector<16x32xf32>
    %21 = arith.mulf %16, %20 : vector<16x32xf32>
    %22 = vector.broadcast %2 : vector<1x32xf32> to vector<16x32xf32>
    %23 = arith.mulf %21, %22 : vector<16x32xf32>
    %24 = vector.broadcast %3 : vector<1x32xf32> to vector<16x32xf32>
    %25 = arith.addf %23, %24 : vector<16x32xf32>
    %26 = arith.truncf %25 : vector<16x32xf32> to vector<16x32xbf16>
    %c0_10 = arith.constant 0 : index
    %c0_11 = arith.constant 0 : index
    %27 = vector.load %arg4[%c0_10, %c0_11] : memref<32x96xbf16, #tpu.memory_space<vmem>>, vector<32x96xbf16>
    %cst_12 = arith.constant dense<0.000000e+00> : vector<16x96xf32>
    %28 = tpu.matmul %26, %27, %cst_12 {dimension_numbers = #tpu.dot_dimension_numbers<[1], [0], [0], [1], [0, 0, 1, 1], [], []>} : vector<16x32xbf16>, vector<32x96xbf16>, vector<16x96xf32> -> vector<16x96xf32>
    %29 = arith.truncf %28 : vector<16x96xf32> to vector<16x96xbf16>
    %30 = vector.shape_cast %29 : vector<16x96xbf16> to vector<2x8x96xbf16>
    %31 = vector.extract_strided_slice %30 {offsets = [0, 0, 0], sizes = [2, 8, 8], strides = [1, 1, 1]} : vector<2x8x96xbf16> to vector<2x8x8xbf16>
    %32 = vector.extract_strided_slice %30 {offsets = [0, 0, 32], sizes = [2, 8, 8], strides = [1, 1, 1]} : vector<2x8x96xbf16> to vector<2x8x8xbf16>
    %33 = vector.extract_strided_slice %30 {offsets = [0, 0, 64], sizes = [2, 8, 8], strides = [1, 1, 1]} : vector<2x8x96xbf16> to vector<2x8x8xbf16>
    %cst_13 = arith.constant dense<0.000000e+00> : vector<2x8x8xf32>
    %34 = tpu.matmul %31, %32, %cst_13 {dimension_numbers = #tpu.dot_dimension_numbers<[2], [2], [1], [1], [0, 0, 0, 1, 1, 1], [0], [0]>} : vector<2x8x8xbf16>, vector<2x8x8xbf16>, vector<2x8x8xf32> -> vector<2x8x8xf32>
    %cst_14 = arith.constant dense<0xFF800000> : vector<2x8xf32>
    %35 = vector.multi_reduction <maximumf>, %34, %cst_14 [2] : vector<2x8x8xf32> to vector<2x8xf32>
    %36 = vector.shape_cast %35 : vector<2x8xf32> to vector<2x8x1xf32>
    %37 = vector.broadcast %36 : vector<2x8x1xf32> to vector<2x8x8xf32>
    %38 = arith.subf %34, %37 : vector<2x8x8xf32>
    %39 = math.exp %38 : vector<2x8x8xf32>
    %cst_15 = arith.constant dense<0.000000e+00> : vector<2x8xf32>
    %40 = vector.multi_reduction <add>, %39, %cst_15 [2] : vector<2x8x8xf32> to vector<2x8xf32>
    %41 = vector.shape_cast %40 : vector<2x8xf32> to vector<2x8x1xf32>
    %42 = tpu.reciprocal %41 {approx = true} : vector<2x8x1xf32> -> vector<2x8x1xf32>
    %43 = arith.truncf %39 : vector<2x8x8xf32> to vector<2x8x8xbf16>
    %cst_16 = arith.constant dense<0.000000e+00> : vector<2x8x8xf32>
    %44 = tpu.matmul %43, %33, %cst_16 {dimension_numbers = #tpu.dot_dimension_numbers<[2], [1], [1], [2], [0, 0, 0, 1, 1, 2], [0], [0]>} : vector<2x8x8xbf16>, vector<2x8x8xbf16>, vector<2x8x8xf32> -> vector<2x8x8xf32>
    %45 = vector.broadcast %42 : vector<2x8x1xf32> to vector<2x8x8xf32>
    %46 = arith.mulf %44, %45 : vector<2x8x8xf32>
    %47 = arith.truncf %46 : vector<2x8x8xf32> to vector<2x8x8xbf16>
    %c0_17 = arith.constant 0 : index
    %c0_18 = arith.constant 0 : index
    %c0_19 = arith.constant 0 : index
    %48 = vector.load %arg14[%c0_17, %c0_18, %c0_19] : memref<2x8x32xbf16, #tpu.memory_space<vmem>>, vector<2x8x8xbf16>
    tpu.vector_store %arg14[%c0_17, %c0_18, %c0_19], %47 {strides = array<i32>} : memref<2x8x32xbf16, #tpu.memory_space<vmem>>, vector<2x8x8xbf16>,
    %49 = vector.extract_strided_slice %30 {offsets = [0, 0, 8], sizes = [2, 8, 8], strides = [1, 1, 1]} : vector<2x8x96xbf16> to vector<2x8x8xbf16>
    %50 = vector.extract_strided_slice %30 {offsets = [0, 0, 40], sizes = [2, 8, 8], strides = [1, 1, 1]} : vector<2x8x96xbf16> to vector<2x8x8xbf16>
    %51 = vector.extract_strided_slice %30 {offsets = [0, 0, 72], sizes = [2, 8, 8], strides = [1, 1, 1]} : vector<2x8x96xbf16> to vector<2x8x8xbf16>
    %cst_20 = arith.constant dense<0.000000e+00> : vector<2x8x8xf32>
    %52 = tpu.matmul %49, %50, %cst_20 {dimension_numbers = #tpu.dot_dimension_numbers<[2], [2], [1], [1], [0, 0, 0, 1, 1, 1], [0], [0]>} : vector<2x8x8xbf16>, vector<2x8x8xbf16>, vector<2x8x8xf32> -> vector<2x8x8xf32>
    %cst_21 = arith.constant dense<0xFF800000> : vector<2x8xf32>
    %53 = vector.multi_reduction <maximumf>, %52, %cst_21 [2] : vector<2x8x8xf32> to vector<2x8xf32>
    %54 = vector.shape_cast %53 : vector<2x8xf32> to vector<2x8x1xf32>
    %55 = vector.broadcast %54 : vector<2x8x1xf32> to vector<2x8x8xf32>
    %56 = arith.subf %52, %55 : vector<2x8x8xf32>
    %57 = math.exp %56 : vector<2x8x8xf32>
    %cst_22 = arith.constant dense<0.000000e+00> : vector<2x8xf32>
    %58 = vector.multi_reduction <add>, %57, %cst_22 [2] : vector<2x8x8xf32> to vector<2x8xf32>
    %59 = vector.shape_cast %58 : vector<2x8xf32> to vector<2x8x1xf32>
    %60 = tpu.reciprocal %59 {approx = true} : vector<2x8x1xf32> -> vector<2x8x1xf32>
    %61 = arith.truncf %57 : vector<2x8x8xf32> to vector<2x8x8xbf16>
    %cst_23 = arith.constant dense<0.000000e+00> : vector<2x8x8xf32>
    %62 = tpu.matmul %61, %51, %cst_23 {dimension_numbers = #tpu.dot_dimension_numbers<[2], [1], [1], [2], [0, 0, 0, 1, 1, 2], [0], [0]>} : vector<2x8x8xbf16>, vector<2x8x8xbf16>, vector<2x8x8xf32> -> vector<2x8x8xf32>
    %63 = vector.broadcast %60 : vector<2x8x1xf32> to vector<2x8x8xf32>
    %64 = arith.mulf %62, %63 : vector<2x8x8xf32>
    %65 = arith.truncf %64 : vector<2x8x8xf32> to vector<2x8x8xbf16>
    %c0_24 = arith.constant 0 : index
    %c0_25 = arith.constant 0 : index
    %c8 = arith.constant 8 : index
    %66 = vector.load %arg14[%c0_24, %c0_25, %c8] : memref<2x8x32xbf16, #tpu.memory_space<vmem>>, vector<2x8x8xbf16>
    tpu.vector_store %arg14[%c0_24, %c0_25, %c8], %65 {strides = array<i32>} : memref<2x8x32xbf16, #tpu.memory_space<vmem>>, vector<2x8x8xbf16>,
    %67 = vector.extract_strided_slice %30 {offsets = [0, 0, 16], sizes = [2, 8, 8], strides = [1, 1, 1]} : vector<2x8x96xbf16> to vector<2x8x8xbf16>
    %68 = vector.extract_strided_slice %30 {offsets = [0, 0, 48], sizes = [2, 8, 8], strides = [1, 1, 1]} : vector<2x8x96xbf16> to vector<2x8x8xbf16>
    %69 = vector.extract_strided_slice %30 {offsets = [0, 0, 80], sizes = [2, 8, 8], strides = [1, 1, 1]} : vector<2x8x96xbf16> to vector<2x8x8xbf16>
    %cst_26 = arith.constant dense<0.000000e+00> : vector<2x8x8xf32>
    %70 = tpu.matmul %67, %68, %cst_26 {dimension_numbers = #tpu.dot_dimension_numbers<[2], [2], [1], [1], [0, 0, 0, 1, 1, 1], [0], [0]>} : vector<2x8x8xbf16>, vector<2x8x8xbf16>, vector<2x8x8xf32> -> vector<2x8x8xf32>
    %cst_27 = arith.constant dense<0xFF800000> : vector<2x8xf32>
    %71 = vector.multi_reduction <maximumf>, %70, %cst_27 [2] : vector<2x8x8xf32> to vector<2x8xf32>
    %72 = vector.shape_cast %71 : vector<2x8xf32> to vector<2x8x1xf32>
    %73 = vector.broadcast %72 : vector<2x8x1xf32> to vector<2x8x8xf32>
    %74 = arith.subf %70, %73 : vector<2x8x8xf32>
    %75 = math.exp %74 : vector<2x8x8xf32>
    %cst_28 = arith.constant dense<0.000000e+00> : vector<2x8xf32>
    %76 = vector.multi_reduction <add>, %75, %cst_28 [2] : vector<2x8x8xf32> to vector<2x8xf32>
    %77 = vector.shape_cast %76 : vector<2x8xf32> to vector<2x8x1xf32>
    %78 = tpu.reciprocal %77 {approx = true} : vector<2x8x1xf32> -> vector<2x8x1xf32>
    %79 = arith.truncf %75 : vector<2x8x8xf32> to vector<2x8x8xbf16>
    %cst_29 = arith.constant dense<0.000000e+00> : vector<2x8x8xf32>
    %80 = tpu.matmul %79, %69, %cst_29 {dimension_numbers = #tpu.dot_dimension_numbers<[2], [1], [1], [2], [0, 0, 0, 1, 1, 2], [0], [0]>} : vector<2x8x8xbf16>, vector<2x8x8xbf16>, vector<2x8x8xf32> -> vector<2x8x8xf32>
    %81 = vector.broadcast %78 : vector<2x8x1xf32> to vector<2x8x8xf32>
    %82 = arith.mulf %80, %81 : vector<2x8x8xf32>
    %83 = arith.truncf %82 : vector<2x8x8xf32> to vector<2x8x8xbf16>
    %c0_30 = arith.constant 0 : index
    %c0_31 = arith.constant 0 : index
    %c16 = arith.constant 16 : index
    %84 = vector.load %arg14[%c0_30, %c0_31, %c16] : memref<2x8x32xbf16, #tpu.memory_space<vmem>>, vector<2x8x8xbf16>
    tpu.vector_store %arg14[%c0_30, %c0_31, %c16], %83 {strides = array<i32>} : memref<2x8x32xbf16, #tpu.memory_space<vmem>>, vector<2x8x8xbf16>,
    %85 = vector.extract_strided_slice %30 {offsets = [0, 0, 24], sizes = [2, 8, 8], strides = [1, 1, 1]} : vector<2x8x96xbf16> to vector<2x8x8xbf16>
    %86 = vector.extract_strided_slice %30 {offsets = [0, 0, 56], sizes = [2, 8, 8], strides = [1, 1, 1]} : vector<2x8x96xbf16> to vector<2x8x8xbf16>
    %87 = vector.extract_strided_slice %30 {offsets = [0, 0, 88], sizes = [2, 8, 8], strides = [1, 1, 1]} : vector<2x8x96xbf16> to vector<2x8x8xbf16>
    %cst_32 = arith.constant dense<0.000000e+00> : vector<2x8x8xf32>
    %88 = tpu.matmul %85, %86, %cst_32 {dimension_numbers = #tpu.dot_dimension_numbers<[2], [2], [1], [1], [0, 0, 0, 1, 1, 1], [0], [0]>} : vector<2x8x8xbf16>, vector<2x8x8xbf16>, vector<2x8x8xf32> -> vector<2x8x8xf32>
    %cst_33 = arith.constant dense<0xFF800000> : vector<2x8xf32>
    %89 = vector.multi_reduction <maximumf>, %88, %cst_33 [2] : vector<2x8x8xf32> to vector<2x8xf32>
    %90 = vector.shape_cast %89 : vector<2x8xf32> to vector<2x8x1xf32>
    %91 = vector.broadcast %90 : vector<2x8x1xf32> to vector<2x8x8xf32>
    %92 = arith.subf %88, %91 : vector<2x8x8xf32>
    %93 = math.exp %92 : vector<2x8x8xf32>
    %cst_34 = arith.constant dense<0.000000e+00> : vector<2x8xf32>
    %94 = vector.multi_reduction <add>, %93, %cst_34 [2] : vector<2x8x8xf32> to vector<2x8xf32>
    %95 = vector.shape_cast %94 : vector<2x8xf32> to vector<2x8x1xf32>
    %96 = tpu.reciprocal %95 {approx = true} : vector<2x8x1xf32> -> vector<2x8x1xf32>
    %97 = arith.truncf %93 : vector<2x8x8xf32> to vector<2x8x8xbf16>
    %cst_35 = arith.constant dense<0.000000e+00> : vector<2x8x8xf32>
    %98 = tpu.matmul %97, %87, %cst_35 {dimension_numbers = #tpu.dot_dimension_numbers<[2], [1], [1], [2], [0, 0, 0, 1, 1, 2], [0], [0]>} : vector<2x8x8xbf16>, vector<2x8x8xbf16>, vector<2x8x8xf32> -> vector<2x8x8xf32>
    %99 = vector.broadcast %96 : vector<2x8x1xf32> to vector<2x8x8xf32>
    %100 = arith.mulf %98, %99 : vector<2x8x8xf32>
    %101 = arith.truncf %100 : vector<2x8x8xf32> to vector<2x8x8xbf16>
    %c0_36 = arith.constant 0 : index
    %c0_37 = arith.constant 0 : index
    %c24 = arith.constant 24 : index
    %102 = vector.load %arg14[%c0_36, %c0_37, %c24] : memref<2x8x32xbf16, #tpu.memory_space<vmem>>, vector<2x8x8xbf16>
    tpu.vector_store %arg14[%c0_36, %c0_37, %c24], %101 {strides = array<i32>} : memref<2x8x32xbf16, #tpu.memory_space<vmem>>, vector<2x8x8xbf16>,
    %c0_38 = arith.constant 0 : index
    %c0_39 = arith.constant 0 : index
    %c0_40 = arith.constant 0 : index
    %103 = vector.load %arg14[%c0_38, %c0_39, %c0_40] : memref<2x8x32xbf16, #tpu.memory_space<vmem>>, vector<2x8x32xbf16>
    %104 = vector.shape_cast %103 : vector<2x8x32xbf16> to vector<16x32xbf16>
    %c0_41 = arith.constant 0 : index
    %c0_42 = arith.constant 0 : index
    %105 = vector.load %arg5[%c0_41, %c0_42] : memref<32x32xbf16, #tpu.memory_space<vmem>>, vector<32x32xbf16>
    %cst_43 = arith.constant dense<0.000000e+00> : vector<16x32xf32>
    %106 = tpu.matmul %104, %105, %cst_43 {dimension_numbers = #tpu.dot_dimension_numbers<[1], [0], [0], [1], [0, 0, 1, 1], [], []>} : vector<16x32xbf16>, vector<32x32xbf16>, vector<16x32xf32> -> vector<16x32xf32>
    %107 = arith.addf %1, %106 : vector<16x32xf32>
    %c0_44 = arith.constant 0 : index
    %c0_45 = arith.constant 0 : index
    %108 = vector.load %arg6[%c0_44, %c0_45] : memref<1x32xf32, #tpu.memory_space<vmem>>, vector<1x32xf32>
    %109 = vector.broadcast %108 : vector<1x32xf32> to vector<16x32xf32>
    %110 = arith.addf %107, %109 : vector<16x32xf32>
    %c0_46 = arith.constant 0 : index
    %c0_47 = arith.constant 0 : index
    %111 = vector.load %arg7[%c0_46, %c0_47] : memref<1x32xf32, #tpu.memory_space<vmem>>, vector<1x32xf32>
    %c0_48 = arith.constant 0 : index
    %c0_49 = arith.constant 0 : index
    %112 = vector.load %arg8[%c0_48, %c0_49] : memref<1x32xf32, #tpu.memory_space<vmem>>, vector<1x32xf32>
    %cst_50 = arith.constant dense<0.000000e+00> : vector<16xf32>
    %113 = vector.multi_reduction <add>, %110, %cst_50 [1] : vector<16x32xf32> to vector<16xf32>
    %114 = vector.shape_cast %113 : vector<16xf32> to vector<16x1xf32>
    %cst_51 = arith.constant 3.200000e+01 : f32
    %115 = vector.broadcast %cst_51 : f32 to vector<16x1xf32>
    %116 = arith.divf %114, %115 : vector<16x1xf32>
    %117 = vector.broadcast %116 : vector<16x1xf32> to vector<16x32xf32>
    %118 = arith.subf %110, %117 : vector<16x32xf32>
    %119 = arith.mulf %118, %118 : vector<16x32xf32>
    %cst_52 = arith.constant dense<0.000000e+00> : vector<16xf32>
    %120 = vector.multi_reduction <add>, %119, %cst_52 [1] : vector<16x32xf32> to vector<16xf32>
    %121 = vector.shape_cast %120 : vector<16xf32> to vector<16x1xf32>
    %cst_53 = arith.constant 3.200000e+01 : f32
    %122 = vector.broadcast %cst_53 : f32 to vector<16x1xf32>
    %123 = arith.divf %121, %122 : vector<16x1xf32>
    %124 = vector.broadcast %116 : vector<16x1xf32> to vector<16x32xf32>
    %125 = arith.subf %110, %124 : vector<16x32xf32>
    %cst_54 = arith.constant 9.99999974E-6 : f32
    %126 = vector.broadcast %cst_54 : f32 to vector<16x1xf32>
    %127 = arith.addf %123, %126 : vector<16x1xf32>
    %128 = math.rsqrt %127 : vector<16x1xf32>
    %129 = vector.broadcast %128 : vector<16x1xf32> to vector<16x32xf32>
    %130 = arith.mulf %125, %129 : vector<16x32xf32>
    %131 = vector.broadcast %111 : vector<1x32xf32> to vector<16x32xf32>
    %132 = arith.mulf %130, %131 : vector<16x32xf32>
    %133 = vector.broadcast %112 : vector<1x32xf32> to vector<16x32xf32>
    %134 = arith.addf %132, %133 : vector<16x32xf32>
    %135 = arith.truncf %134 : vector<16x32xf32> to vector<16x32xbf16>
    %c0_55 = arith.constant 0 : index
    %c0_56 = arith.constant 0 : index
    %136 = vector.load %arg9[%c0_55, %c0_56] : memref<32x64xbf16, #tpu.memory_space<vmem>>, vector<32x64xbf16>
    %cst_57 = arith.constant dense<0.000000e+00> : vector<16x64xf32>
    %137 = tpu.matmul %135, %136, %cst_57 {dimension_numbers = #tpu.dot_dimension_numbers<[1], [0], [0], [1], [0, 0, 1, 1], [], []>} : vector<16x32xbf16>, vector<32x64xbf16>, vector<16x64xf32> -> vector<16x64xf32>
    %c0_58 = arith.constant 0 : index
    %c0_59 = arith.constant 0 : index
    %138 = vector.load %arg10[%c0_58, %c0_59] : memref<1x64xf32, #tpu.memory_space<vmem>>, vector<1x64xf32>
    %139 = vector.broadcast %138 : vector<1x64xf32> to vector<16x64xf32>
    %140 = arith.addf %137, %139 : vector<16x64xf32>
    %cst_60 = arith.constant 5.000000e-01 : f32
    %141 = vector.broadcast %cst_60 : f32 to vector<16x64xf32>
    %142 = arith.mulf %141, %140 : vector<16x64xf32>
    %cst_61 = arith.constant 0.707106769 : f32
    %143 = vector.broadcast %cst_61 : f32 to vector<16x64xf32>
    %144 = arith.mulf %140, %143 : vector<16x64xf32>
    %145 = math.erf %144 : vector<16x64xf32>
    %cst_62 = arith.constant 1.000000e+00 : f32
    %146 = vector.broadcast %cst_62 : f32 to vector<16x64xf32>
    %147 = arith.addf %146, %145 : vector<16x64xf32>
    %148 = arith.mulf %142, %147 : vector<16x64xf32>
    %149 = arith.truncf %148 : vector<16x64xf32> to vector<16x64xbf16>
    %c0_63 = arith.constant 0 : index
    %c0_64 = arith.constant 0 : index
    %150 = vector.load %arg11[%c0_63, %c0_64] : memref<64x32xbf16, #tpu.memory_space<vmem>>, vector<64x32xbf16>
    %cst_65 = arith.constant dense<0.000000e+00> : vector<16x32xf32>
    %151 = tpu.matmul %149, %150, %cst_65 {dimension_numbers = #tpu.dot_dimension_numbers<[1], [0], [0], [1], [0, 0, 1, 1], [], []>} : vector<16x64xbf16>, vector<64x32xbf16>, vector<16x32xf32> -> vector<16x32xf32>
    %c0_66 = arith.constant 0 : index
    %c0_67 = arith.constant 0 : index
    %152 = vector.load %arg12[%c0_66, %c0_67] : memref<1x32xf32, #tpu.memory_space<vmem>>, vector<1x32xf32>
    %153 = vector.broadcast %152 : vector<1x32xf32> to vector<16x32xf32>
    %154 = arith.addf %151, %153 : vector<16x32xf32>
    %155 = arith.addf %110, %154 : vector<16x32xf32>
    %156 = vector.shape_cast %155 : vector<16x32xf32> to vector<2x8x32xf32>
    %c0_68 = arith.constant 0 : index
    %c0_69 = arith.constant 0 : index
    %c0_70 = arith.constant 0 : index
    %157 = vector.load %arg13[%c0_68, %c0_69, %c0_70] : memref<2x8x32xf32, #tpu.memory_space<vmem>>, vector<2x8x32xf32>
    tpu.vector_store %arg13[%c0_68, %c0_69, %c0_70], %156 {strides = array<i32>} : memref<2x8x32xf32, #tpu.memory_space<vmem>>, vector<2x8x32xf32>,
    return
  }
  func.func @transform_0(%arg0: i32) -> (i32, i32, i32) {
    %c0_i32 = arith.constant 0 : i32
    %c0_i32_0 = arith.constant 0 : i32
    %c0_i32_1 = arith.constant 0 : i32
    return %arg0, %c0_i32, %c0_i32_0 : i32, i32, i32
  }
  func.func @transform_1(%arg0: i32) -> (i32, i32) {
    %c0_i32 = arith.constant 0 : i32
    %c0_i32_0 = arith.constant 0 : i32
    %c0_i32_1 = arith.constant 0 : i32
    return %c0_i32, %c0_i32_0 : i32, i32
  }
  func.func @transform_2(%arg0: i32) -> (i32, i32) {
    %c0_i32 = arith.constant 0 : i32
    %c0_i32_0 = arith.constant 0 : i32
    %c0_i32_1 = arith.constant 0 : i32
    return %c0_i32, %c0_i32_0 : i32, i32
  }
  func.func @transform_3(%arg0: i32) -> (i32, i32) {
    %c0_i32 = arith.constant 0 : i32
    %c0_i32_0 = arith.constant 0 : i32
    %c0_i32_1 = arith.constant 0 : i32
    return %c0_i32, %c0_i32_0 : i32, i32
  }
  func.func @transform_4(%arg0: i32) -> (i32, i32) {
    %c0_i32 = arith.constant 0 : i32
    %c0_i32_0 = arith.constant 0 : i32
    %c0_i32_1 = arith.constant 0 : i32
    return %c0_i32, %c0_i32_0 : i32, i32
  }
  func.func @transform_5(%arg0: i32) -> (i32, i32) {
    %c0_i32 = arith.constant 0 : i32
    %c0_i32_0 = arith.constant 0 : i32
    %c0_i32_1 = arith.constant 0 : i32
    return %c0_i32, %c0_i32_0 : i32, i32
  }
  func.func @transform_6(%arg0: i32) -> (i32, i32) {
    %c0_i32 = arith.constant 0 : i32
    %c0_i32_0 = arith.constant 0 : i32
    %c0_i32_1 = arith.constant 0 : i32
    return %c0_i32, %c0_i32_0 : i32, i32
  }
  func.func @transform_7(%arg0: i32) -> (i32, i32) {
    %c0_i32 = arith.constant 0 : i32
    %c0_i32_0 = arith.constant 0 : i32
    %c0_i32_1 = arith.constant 0 : i32
    return %c0_i32, %c0_i32_0 : i32, i32
  }
  func.func @transform_8(%arg0: i32) -> (i32, i32) {
    %c0_i32 = arith.constant 0 : i32
    %c0_i32_0 = arith.constant 0 : i32
    %c0_i32_1 = arith.constant 0 : i32
    return %c0_i32, %c0_i32_0 : i32, i32
  }
  func.func @transform_9(%arg0: i32) -> (i32, i32) {
    %c0_i32 = arith.constant 0 : i32
    %c0_i32_0 = arith.constant 0 : i32
    %c0_i32_1 = arith.constant 0 : i32
    return %c0_i32, %c0_i32_0 : i32, i32
  }
  func.func @transform_10(%arg0: i32) -> (i32, i32) {
    %c0_i32 = arith.constant 0 : i32
    %c0_i32_0 = arith.constant 0 : i32
    %c0_i32_1 = arith.constant 0 : i32
    return %c0_i32, %c0_i32_0 : i32, i32
  }
  func.func @transform_11(%arg0: i32) -> (i32, i32) {
    %c0_i32 = arith.constant 0 : i32
    %c0_i32_0 = arith.constant 0 : i32
    %c0_i32_1 = arith.constant 0 : i32
    return %c0_i32, %c0_i32_0 : i32, i32
  }
  func.func @transform_12(%arg0: i32) -> (i32, i32, i32) {
    %c0_i32 = arith.constant 0 : i32
    %c0_i32_0 = arith.constant 0 : i32
    %c0_i32_1 = arith.constant 0 : i32
    return %arg0, %c0_i32, %c0_i32_0 : i32, i32, i32
  }
}

</mosaic_0001>

<bundles_post_ra>
// kernel: transformer_encoder.2
= control target key start
LH: loop header
LB: loop body
LE: loop exit
PB: predicated region body
PF: predicated region fallthrough
CT: control target
= control target key end

     0   :  { %17 = vsyncpa [#allocation4], 0  ;;  %s2337_s0 = inlined_call_operand.vmem [shape: f32[2,8,32], index: 0, kind: input, shape index: {}]   ;;  %s2338_s1 = inlined_call_operand.hbm [shape: f32[1,32], index: 1, kind: input, shape index: {}]   ;;  %s2339_s2 = inlined_call_operand.hbm [shape: f32[1,32], index: 2, kind: input, shape index: {}]   ;;  %s2340_s3 = inlined_call_operand.vmem [shape: bf16[32,96], index: 3, kind: input, shape index: {}]   ;;  %s2341_s4 = inlined_call_operand.vmem [shape: bf16[32,32], index: 4, kind: input, shape index: {}]   ;;  %s2342_s5 = inlined_call_operand.hbm [shape: f32[1,32], index: 5, kind: input, shape index: {}]   ;;  %s2343_s6 = inlined_call_operand.hbm [shape: f32[1,32], index: 6, kind: input, shape index: {}]   ;;  %s2344_s7 = inlined_call_operand.hbm [shape: f32[1,32], index: 7, kind: input, shape index: {}]   ;;  %s2345_s8 = inlined_call_operand.hbm [shape: bf16[32,64], index: 8, kind: input, shape index: {}]   ;;  %s2346_s9 = inlined_call_operand.hbm [shape: f32[1,64], index: 9, kind: input, shape index: {}]   ;;  %s2347_s10 = inlined_call_operand.vmem [shape: bf16[64,32], index: 10, kind: input, shape index: {}]   ;;  %s2348_s11 = inlined_call_operand.hbm [shape: f32[1,32], index: 11, kind: input, shape index: {}]   ;;  %s2349_s12 = inlined_call_operand.vmem [shape: f32[2,8,32], index: 12, kind: output, shape index: {}]  }
   0x1   :  { %18 = vsyncpa [#allocation6], 0 }
   0x2   :  { %19 = vsyncpa [#allocation9], 0 }
   0x3   :  { %20 = vsyncpa [#allocation12], 0 }
   0x4   :  { %21 = vsyncpa [#allocation15], 0  ;;  %s1966_s21 = smov [#allocation5]   ;;  %s1967_s23 = smov [#allocation8]  }
   0x5   :  { %s40_s22 = sshll.u32 %s1966_s21, 4  ;;  %s64_s24 = sshll.u32 %s1967_s23, 4  ;;  %s41_s22 = int_to_ptr.vmem [resolvable:$true] %s40_s22  ;;  %s65_s24 = int_to_ptr.vmem [resolvable:$true] %s64_s24 }
   0x6   :  { %s1804_s25 = scalar_lea.vmem %s41_s22, 16  ;;  %s1808_s26 = scalar_lea.vmem %s41_s22, 32 }
   0x7   :  { %p1805_p0 = scmp.ne.s32.totalorder %s41_s22, %s1804_s25  ;;  %p1809_p1 = scmp.lt.s32.totalorder %s41_s22, %s41_s22 }
   0x8   :  { %p1810_p2 = scmp.lt.s32.totalorder %s1808_s26, %s1804_s25 }
   0xa   :  { %p1811_p3 = por %p1810_p2, %p1809_p1 }
   0xc   :  { %p1812_p4 = pnand %p1811_p3, %p1805_p0 }
   0xe   :  { %1815 = shalt.err (!%p1812_p4)
}
   0xf   :  { %43 = dma.hbm_to_vmem [thread:$0]  %s2339_s2, 16, %s41_s22, [#allocation6]  }
  0x10   :  { %s1824_s29 = scalar_lea.vmem %s65_s24, 16  ;;  %s1828_s30 = scalar_lea.vmem %s65_s24, 32 }
  0x11   :  { %p1825_p5 = scmp.ne.s32.totalorder %s65_s24, %s1824_s29  ;;  %p1829_p6 = scmp.lt.s32.totalorder %s65_s24, %s65_s24 }
  0x12   :  { %p1830_p7 = scmp.lt.s32.totalorder %s1828_s30, %s1824_s29 }
  0x14   :  { %p1831_p8 = por %p1830_p7, %p1829_p6 }
  0x16   :  { %p1832_p9 = pnand %p1831_p8, %p1825_p5 }
  0x18   :  { %1835 = shalt.err (!%p1832_p9)
}
  0x19   :  { %67 = dma.hbm_to_vmem [thread:$0]  %s2343_s6, 16, %s65_s24, [#allocation9]  }
  0x1a   :  { %s1968_s15 = smov [#allocation11]  }
  0x1b   :  { %s83_s16 = sshll.u32 %s1968_s15, 4  ;;  %s84_s16 = int_to_ptr.vmem [resolvable:$true] %s83_s16 }
  0x1c   :  { %s1844_s17 = scalar_lea.vmem %s84_s16, 256  ;;  %p1849_p11 = scmp.lt.s32.totalorder %s84_s16, %s84_s16 }
  0x1d   :  { %p1845_p10 = scmp.ne.s32.totalorder %s84_s16, %s1844_s17  ;;  %p1850_p12 = scmp.lt.s32.totalorder %s1844_s17, %s1844_s17 }
  0x1f   :  { %p1851_p13 = por %p1850_p12, %p1849_p11 }
  0x21   :  { %p1852_p0 = pnand %p1851_p13, %p1845_p10 }
  0x23   :  { %1855 = shalt.err (!%p1852_p0)
}
  0x24   :  { %s1969_s2 = smov 64   ;;  %s1970_s18 = smov 4  }
  0x25   :  { %89 = dma.hbm_to_vmem [thread:$0]  %s2345_s8, 256, %s84_s16, [#allocation12], %s1969_s2, %s1969_s2, %s1970_s18  }
  0x26   :  { %s1971_s21 = smov [#allocation3]   ;;  %s1972_s22 = smov [#allocation7]  }
  0x27   :  { %s30_s6 = sshll.u32 %s1971_s21, 4  ;;  %s54_s23 = sshll.u32 %s1972_s22, 4  ;;  %s31_s6 = int_to_ptr.vmem [resolvable:$true] %s30_s6  ;;  %s55_s23 = int_to_ptr.vmem [resolvable:$true] %s54_s23 }
  0x28   :  { %s1864_s24 = scalar_lea.vmem %s31_s6, 16  ;;  %s1868_s25 = scalar_lea.vmem %s31_s6, 32 }
  0x29   :  { %p1865_p1 = scmp.ne.s32.totalorder %s31_s6, %s1864_s24  ;;  %p1869_p2 = scmp.lt.s32.totalorder %s31_s6, %s31_s6 }
  0x2a   :  { %p1870_p3 = scmp.lt.s32.totalorder %s1868_s25, %s1864_s24 }
  0x2c   :  { %p1871_p4 = por %p1870_p3, %p1869_p2 }
  0x2e   :  { %p1872_p5 = pnand %p1871_p4, %p1865_p1 }
  0x30   :  { %1875 = shalt.err (!%p1872_p5)
}
  0x31   :  { %33 = dma.hbm_to_vmem [thread:$0]  %s2338_s1, 16, %s31_s6, [#allocation4]  }
  0x32   :  { %s1884_s28 = scalar_lea.vmem %s55_s23, 16  ;;  %s1888_s8 = scalar_lea.vmem %s55_s23, 32 }
  0x33   :  { %p1885_p6 = scmp.ne.s32.totalorder %s55_s23, %s1884_s28  ;;  %p1889_p7 = scmp.lt.s32.totalorder %s55_s23, %s55_s23 }
  0x34   :  { %p1890_p8 = scmp.lt.s32.totalorder %s1888_s8, %s1884_s28 }
  0x36   :  { %p1891_p9 = por %p1890_p8, %p1889_p7 }
  0x38   :  { %p1892_p10 = pnand %p1891_p9, %p1885_p6 }
  0x3a   :  { %1895 = shalt.err (!%p1892_p10)
}
  0x3b   :  { %57 = dma.hbm_to_vmem [thread:$0]  %s2342_s5, 16, %s55_s23, [#allocation6]  }
  0x3c   :  { %s1973_s13 = smov [#allocation10]   ;;  %s1974_s15 = smov [#allocation13]  }
  0x3d   :  { %s74_s14 = sshll.u32 %s1973_s13, 4  ;;  %s96_s16 = sshll.u32 %s1974_s15, 4  ;;  %s75_s14 = int_to_ptr.vmem [resolvable:$true] %s74_s14  ;;  %s97_s16 = int_to_ptr.vmem [resolvable:$true] %s96_s16 }
  0x3e   :  { %s1904_s17 = scalar_lea.vmem %s75_s14, 16  ;;  %s1908_s1 = scalar_lea.vmem %s75_s14, 32 }
  0x3f   :  { %p1905_p11 = scmp.ne.s32.totalorder %s75_s14, %s1904_s17  ;;  %p1909_p12 = scmp.lt.s32.totalorder %s75_s14, %s75_s14 }
  0x40   :  { %p1910_p13 = scmp.lt.s32.totalorder %s1908_s1, %s1904_s17 }
  0x42   :  { %p1911_p0 = por %p1910_p13, %p1909_p12 }
  0x44   :  { %p1912_p1 = pnand %p1911_p0, %p1905_p11 }
  0x46   :  { %1915 = shalt.err (!%p1912_p1)
}
  0x47   :  { %77 = dma.hbm_to_vmem [thread:$0]  %s2344_s7, 16, %s75_s14, [#allocation9]  }
  0x48   :  { %s1924_s20 = scalar_lea.vmem %s97_s16, 16  ;;  %s1928_s5 = scalar_lea.vmem %s97_s16, 32 }
  0x49   :  { %p1925_p2 = scmp.ne.s32.totalorder %s97_s16, %s1924_s20  ;;  %p1929_p3 = scmp.lt.s32.totalorder %s97_s16, %s97_s16 }
  0x4a   :  { %p1930_p4 = scmp.lt.s32.totalorder %s1928_s5, %s1924_s20 }
  0x4c   :  { %p1931_p5 = por %p1930_p4, %p1929_p3 }
  0x4e   :  { %p1932_p6 = pnand %p1931_p5, %p1925_p2 }
  0x50   :  { %1935 = shalt.err (!%p1932_p6)
}
  0x51   :  { %99 = dma.hbm_to_vmem [thread:$0]  %s2346_s9, 16, %s97_s16, [#allocation12]  }
  0x52   :  { %s1975_s22 = smov [#allocation14]  }
  0x53   :  { %s108_s23 = sshll.u32 %s1975_s22, 4  ;;  %s109_s23 = int_to_ptr.vmem [resolvable:$true] %s108_s23 }
  0x54   :  { %s1944_s24 = scalar_lea.vmem %s109_s23, 16  ;;  %s1948_s25 = scalar_lea.vmem %s109_s23, 32 }
  0x55   :  { %p1945_p7 = scmp.ne.s32.totalorder %s109_s23, %s1944_s24  ;;  %p1949_p8 = scmp.lt.s32.totalorder %s109_s23, %s109_s23 }
  0x56   :  { %p1950_p9 = scmp.lt.s32.totalorder %s1948_s25, %s1944_s24 }
  0x58   :  { %p1951_p10 = por %p1950_p9, %p1949_p8 }
  0x5a   :  { %p1952_p11 = pnand %p1951_p10, %p1945_p7 }
  0x5c   :  { %1955 = shalt.err (!%p1952_p11)
}
  0x5d   :  { %111 = dma.hbm_to_vmem [thread:$0]  %s2348_s11, 16, %s109_s23, [#allocation15]  }
  0x5e   :  { %1956 = dma.done.wait [#allocation4], 16  }
  0x5f   :  { %1957 = vsyncadd [#allocation4], 4294967280 }
  0x60   :  { %1958 = dma.done.wait [#allocation6], 32  }
  0x61   :  { %1959 = vsyncadd [#allocation6], 4294967264 }
  0x62   :  { %1960 = dma.done.wait [#allocation9], 32  }
  0x63   :  { %1961 = vsyncadd [#allocation9], 4294967264 }
  0x64   :  { %1962 = dma.done.wait [#allocation12], 272  }
  0x65   :  { %1963 = vsyncadd [#allocation12], 4294967024 }
  0x66   :  { %1964 = dma.done.wait [#allocation15], 16  }
  0x67   :  { %1965 = vsyncadd [#allocation15], 4294967280  ;;  %vm141_vm0 = vcmask 261120   ;;  %v2085_v0 = vld [vmem:[%s2337_s0] sm:$0xff]  ;;  %v2090_v1 = vld [vmem:[%s2337_s0 + $0x8] sm:$0xff]  ;;  %v1976_v15 = vmov 0.0  }
  0x68   :  { %v142_v2 = vsel %vm141_vm0, %v2085_v0, 0.0  ;;  %v145_v3 = vsel %vm141_vm0, %v2090_v1, 0.0  ;;  %v1741_v14 = vld [vmem:[%s2340_s3 + $0x8] sm:$0xff]   ;;  %1584 = vmatprep.subr.bf16.mxu0 %v1976_v15  ;;  %vm1977_vm1 = vmmov 0   ;;  %v1742_v16 = vld [vmem:[%s2340_s3] sm:$0xff]   ;;  %1592 = vmatprep.subr.bf16.mxu1 %v1976_v15  ;;  %s1978_s3 = smov 96  }
  0x69   :  { %143 = vadd.xlane.f32.xlu0 %v142_v2  ;;  %1588 = vmatprep.mubr.msk.bf16.mxu0 %vm1977_vm1, %v1976_v15  ;;  %v1484_v25 = vld [vmem:[#allocation3] ss:$0 sm:$0xff]  ;;  %v1485_v29 = vld [vmem:[#allocation5] ss:$0 sm:$0xff]  ;;  %vm254_vm2 = vcmask 64512   ;;  %s1979_s13 = smov 88  }
  0x6a   :  { %1585 = vmatpush3.bf16.msra.mxu0 %v1741_v14  ;;  %1594 = vmatprep.mubr.msk.bf16.mxu1 %vm1977_vm1, %v1976_v15  ;;  %s1980_s14 = smov 120   ;;  %s1981_s15 = smov 56   ;;  %vm376_vm3 = vcmask 1043456   ;;  %vm472_vm4 = vcmask 60416   ;;  %vm709_vm5 = vcmask 126016   ;;  %vm946_vm6 = vcmask 191616  }
  0x6b   :  { %1586 = vmatprep.subr.bf16.mxu0 %v1976_v15  ;;  %s1983_s16 = smov 112   ;;  %s1984_s17 = smov 48   ;;  %vm1183_vm7 = vcmask 257216   ;;  %vm1426_vm8 = vcmask 523264  }
  0x6c   :  { %s1985_s1 = smov 72   ;;  %s1986_s18 = smov 104  }
  0x6d   :  { %146 = vadd.xlane.f32.xlu0 %v145_v3  ;;  %s1987_s19 = smov 40   ;;  %s1988_s20 = smov 8  }
  0x6e   :  { %1587 = vmatpush3.bf16.msra.mxu0 %v1742_v16  ;;  %s1989_s5 = smov 16   ;;  %s1990_s24 = smov 24  }
  0x6f   :  { %1598 = vmatprep.subr.bf16.mxu0 %v1976_v15 }
  0xf2   :  { %v144_v4 = vpop.xlane.xlu0 %143 }
  0xf3   :  { %v149_v5 = vmul.f32 0.03125, %v144_v4 }
  0xf5   :  { %v151_v6 = vsub.f32 %v2085_v0, %v149_v5 }
  0xf6   :  { %v147_v7 = vpop.xlane.xlu0 %146 }
  0xf7   :  { %v150_v8 = vmul.f32 0.03125, %v147_v7  ;;  %v153_v9 = vmul.f32 %v151_v6, %v151_v6 }
  0xf9   :  { %v152_v10 = vsub.f32 %v2090_v1, %v150_v8  ;;  %v155_v11 = vsel %vm141_vm0, %v153_v9, 0.0 }
  0xfa   :  { %156 = vadd.xlane.f32.xlu1 %v155_v11 }
  0xfb   :  { %v154_v12 = vmul.f32 %v152_v10, %v152_v10 }
  0xfd   :  { %v158_v13 = vsel %vm141_vm0, %v154_v12, 0.0 }
  0xfe   :  { %159 = vadd.xlane.f32.xlu1 %v158_v13 }
 0x183   :  { %v157_v17 = vpop.xlane.xlu1 %156 }
 0x184   :  { %v161_v18 = vmul.f32 0.03125, %v157_v17 }
 0x186   :  { %v163_v19 = vadd.f32 1e-05, %v161_v18 }
 0x187   :  { %v160_v20 = vpop.xlane.xlu1 %159 }
 0x188   :  { %1752 = vrsqrt.f32 %v163_v19  ;;  %v162_v21 = vmul.f32 0.03125, %v160_v20 }
 0x18a   :  { %v164_v22 = vadd.f32 1e-05, %v162_v21 }
 0x18c   :  { %1754 = vrsqrt.f32 %v164_v22 }
 0x195   :  { %v1753_v23 = vpop.eup %1752 }
 0x196   :  { %v167_v24 = vmul.f32 %v1753_v23, %v151_v6 }
 0x198   :  { %v175_v28 = vmul.f32 %v1484_v25, %v167_v24 }
 0x199   :  { %v1755_v26 = vpop.eup %1754 }
 0x19a   :  { %v168_v27 = vmul.f32 %v1755_v26, %v152_v10  ;;  %v183_v31 = vadd.f32 %v1485_v29, %v175_v28 }
 0x19c   :  { %v176_v30 = vmul.f32 %v1484_v25, %v168_v27 }
 0x19e   :  { %v184_v32 = vadd.f32 %v1485_v29, %v176_v30 }
 0x1a0   :  { %v185_v33 = vpack.c.bf16 %v184_v32, %v183_v31 }
 0x1a2   :  { %1589 = vmatmul.mubr.msk.bf16.vlgmr.msra.gmra.mxu0 %vm141_vm0, %v185_v33 }
 0x1a3   :  { %1600 = vmatprep.mubr.msk.bf16.mxu0 %vm1977_vm1, %v1976_v15 }
 0x262   :  { %v239_v34 = vpop.f32.mrf.mxu0 }
 0x263   :  { %v2117_v35 = vpack.c.bf16 %v239_v34, %v239_v34 }
 0x264   :  { %v1590_v36 = vpop.f32.mrf.mxu0 }
 0x265   :  { %252 = vrot.lane.b32.xlu0 %v2117_v35, %s1978_s3 }
 0x266   :  { %v242_v37 = vpop.f32.mrf.mxu0 }
 0x267   :  { %v2120_v38 = vpack.c.bf16 %v242_v37, %v242_v37 }
 0x268   :  { %v1591_v39 = vpop.f32.mrf.mxu0 }
 0x269   :  { %301 = vrot.lane.b32.xlu1 %v2120_v38, %s1978_s3 }
 0x2d7   :  { %v253_v40 = vpop.permute.xlu0 %252 }
 0x2d8   :  { %v259_v41 = vsel %vm254_vm2, %v253_v40, 0 }
 0x2d9   :  { %1593 = vmatpush3.bf16.xpose.msra.mxu1 %v259_v41 }
 0x2da   :  { %1604 = vmatprep.subr.bf16.mxu1 %v1976_v15 }
 0x2db   :  { %v302_v42 = vpop.permute.xlu1 %301 }
 0x2dc   :  { %v307_v43 = vsel %vm254_vm2, %v302_v42, 0 }
 0x2dd   :  { %1599 = vmatpush3.bf16.xpose.msra.mxu0 %v307_v43 }
 0x2de   :  { %1610 = vmatprep.subr.bf16.mxu0 %v1976_v15 }
 0x2e0   :  { %1595 = vmatmul.mubr.msk.bf16.vlgmr.msra.gmra.mxu1 %vm254_vm2, %v2117_v35 }
 0x2e1   :  { %1606 = vmatprep.mubr.msk.bf16.mxu1 %vm1977_vm1, %v1976_v15 }
 0x2e4   :  { %1601 = vmatmul.mubr.msk.bf16.vlgmr.msra.gmra.mxu0 %vm254_vm2, %v2120_v38 }
 0x2e5   :  { %1612 = vmatprep.mubr.msk.bf16.mxu0 %vm1977_vm1, %v1976_v15 }
 0x3a0   :  { %v295_v44 = vpop.f32.mrf.mxu1 }
 0x3a1   :  { %v349_v45 = vsel %vm254_vm2, %v295_v44, -inf }
 0x3a2   :  { %v1596_v46 = vpop.f32.mrf.mxu1  ;;  %350 = vmax.xlane.f32.xlu1 %v349_v45 }
 0x3a4   :  { %v298_v47 = vpop.f32.mrf.mxu1  ;;  %v343_v48 = vpop.f32.mrf.mxu0 }
 0x3a5   :  { %v352_v49 = vsel %vm254_vm2, %v343_v48, -inf }
 0x3a6   :  { %v1597_v50 = vpop.f32.mrf.mxu1  ;;  %353 = vmax.xlane.f32.xlu0 %v352_v49  ;;  %v1602_v51 = vpop.f32.mrf.mxu0 }
 0x3a8   :  { %v346_v52 = vpop.f32.mrf.mxu0 }
 0x3aa   :  { %v1603_v53 = vpop.f32.mrf.mxu0 }
 0x3b3   :  { %420 = vrot.lane.b32.xlu1 %v2120_v38, %s1969_s2 }
 0x3b7   :  { %477 = vrot.lane.b32.xlu1 %v2117_v35, %s1979_s13 }
 0x3bb   :  { %527 = vrot.lane.b32.xlu1 %v2120_v38, %s1979_s13 }
 0x3bc   :  { %371 = vrot.lane.b32.xlu0 %v2117_v35, %s1969_s2  ;;  %s1982_s2 = smov 80  }
 0x3bf   :  { %525 = vrot.lane.b32.xlu1 %v2120_v38, %s1980_s14 }
 0x3c0   :  { %475 = vrot.lane.b32.xlu0 %v2117_v35, %s1980_s14 }
 0x3c3   :  { %645 = vrot.lane.b32.xlu1 %v2120_v38, %s1981_s15 }
 0x42b   :  { %v351_v54 = vpop.xlane.xlu1 %350 }
 0x42c   :  { %v355_v55 = vsub.f32 %v295_v44, %v351_v54 }
 0x42e   :  { %v357_v56 = vmul.f32 1.442695, %v355_v55 }
 0x42f   :  { %v421_v57 = vpop.permute.xlu1 %420  ;;  %v354_v58 = vpop.xlane.xlu0 %353 }
 0x430   :  { %1756 = vpow2.f32 %v357_v56  ;;  %v426_v59 = vsel %vm376_vm3, %v421_v57, 0  ;;  %v356_v60 = vsub.f32 %v343_v48, %v354_v58 }
 0x431   :  { %1611 = vmatpush3.bf16.msra.mxu0 %v426_v59 }
 0x432   :  { %v359_v61 = vmul.f32 1.442695, %v356_v60  ;;  %1622 = vmatprep.subr.bf16.mxu0 %v1976_v15 }
 0x433   :  { %v372_v62 = vpop.permute.xlu0 %371  ;;  %v478_v2 = vpop.permute.xlu1 %477 }
 0x434   :  { %1758 = vpow2.f32 %v359_v61  ;;  %v378_v63 = vsel %vm376_vm3, %v372_v62, 0  ;;  %v483_v6 = vsel %vm254_vm2, %v478_v2, 0 }
 0x435   :  { %1605 = vmatpush3.bf16.msra.mxu1 %v378_v63 }
 0x436   :  { %1616 = vmatprep.subr.bf16.mxu1 %v1976_v15 }
 0x437   :  { %v528_v4 = vpop.permute.xlu1 %527  ;;  %v476_v11 = vpop.permute.xlu0 %475 }
 0x438   :  { %v533_v10 = vsel %vm254_vm2, %v528_v4, 0 }
 0x43b   :  { %v526_v9 = vpop.permute.xlu1 %525 }
 0x43d   :  { %v2151_v3 = vpop.eup %1756 }
 0x43e   :  { %v369_v5 = vpack.c.bf16 %v2151_v3, %v2151_v3 }
 0x43f   :  { %v646_v12 = vpop.permute.xlu1 %645 }
 0x440   :  { %1607 = vmatmul.mubr.msk.bf16.vlgmr.msra.gmra.mxu1 %vm254_vm2, %v369_v5  ;;  %v651_v13 = vsel %vm376_vm3, %v646_v12, 0 }
 0x441   :  { %v2157_v7 = vpop.eup %1758  ;;  %1617 = vmatpush3.bf16.xpose.msra.mxu1 %v483_v6  ;;  %1618 = vmatprep.mubr.msk.bf16.mxu1 %vm1977_vm1, %v1976_v15 }
 0x442   :  { %v370_v8 = vpack.c.bf16 %v2157_v7, %v2157_v7  ;;  %1628 = vmatprep.subr.bf16.mxu1 %v1976_v15 }
 0x444   :  { %1613 = vmatmul.mubr.msk.bf16.vlgmr.msra.gmra.mxu0 %vm254_vm2, %v370_v8 }
 0x445   :  { %1623 = vmatpush3.bf16.xpose.msra.mxu0 %v533_v10  ;;  %1624 = vmatprep.mubr.msk.bf16.mxu0 %vm1977_vm1, %v1976_v15 }
 0x446   :  { %1634 = vmatprep.subr.bf16.mxu0 %v1976_v15 }
 0x448   :  { %1619 = vmatmul.mubr.msk.bf16.vlgmr.msra.gmra.mxu1 %vm254_vm2, %v476_v11 }
 0x449   :  { %1630 = vmatprep.mubr.msk.bf16.mxu1 %vm1977_vm1, %v1976_v15 }
 0x44c   :  { %1625 = vmatmul.mubr.msk.bf16.vlgmr.msra.gmra.mxu0 %vm254_vm2, %v526_v9 }
 0x44d   :  { %1635 = vmatpush3.bf16.msra.mxu0 %v651_v13  ;;  %1636 = vmatprep.mubr.msk.bf16.mxu0 %vm1977_vm1, %v1976_v15 }
 0x44e   :  { %1646 = vmatprep.subr.bf16.mxu0 %v1976_v15 }
 0x500   :  { %v2177_v14 = vpop.f32.mrf.mxu1 }
 0x502   :  { %v1608_v16 = vpop.f32.mrf.mxu1 }
 0x504   :  { %v417_v17 = vpop.f32.mrf.mxu1  ;;  %v2179_v18 = vpop.f32.mrf.mxu0 }
 0x506   :  { %v1609_v19 = vpop.f32.mrf.mxu1  ;;  %v1614_v20 = vpop.f32.mrf.mxu0 }
 0x508   :  { %v465_v21 = vpop.f32.mrf.mxu0  ;;  %v519_v22 = vpop.f32.mrf.mxu1 }
 0x509   :  { %v575_v23 = vsel %vm254_vm2, %v519_v22, -inf }
 0x50a   :  { %576 = vmax.xlane.f32.xlu0 %v575_v23  ;;  %v1615_v24 = vpop.f32.mrf.mxu0  ;;  %v1620_v25 = vpop.f32.mrf.mxu1 }
 0x50c   :  { %v522_v26 = vpop.f32.mrf.mxu1  ;;  %v569_v27 = vpop.f32.mrf.mxu0 }
 0x50d   :  { %v578_v28 = vsel %vm254_vm2, %v569_v27, -inf }
 0x50e   :  { %v1621_v29 = vpop.f32.mrf.mxu1  ;;  %579 = vmax.xlane.f32.xlu1 %v578_v28  ;;  %v1626_v30 = vpop.f32.mrf.mxu0 }
 0x510   :  { %v572_v31 = vpop.f32.mrf.mxu0 }
 0x512   :  { %v1627_v32 = vpop.f32.mrf.mxu0 }
 0x51f   :  { %764 = vrot.lane.b32.xlu1 %v2120_v38, %s1982_s2 }
 0x520   :  { %597 = vrot.lane.b32.xlu0 %v2117_v35, %s1981_s15 }
 0x523   :  { %762 = vrot.lane.b32.xlu1 %v2120_v38, %s1983_s16 }
 0x524   :  { %714 = vrot.lane.b32.xlu0 %v2117_v35, %s1982_s2 }
 0x527   :  { %882 = vrot.lane.b32.xlu1 %v2120_v38, %s1984_s17 }
 0x528   :  { %712 = vrot.lane.b32.xlu0 %v2117_v35, %s1983_s16 }
 0x593   :  { %v577_v33 = vpop.xlane.xlu0 %576 }
 0x594   :  { %v581_v34 = vsub.f32 %v519_v22, %v577_v33 }
 0x596   :  { %v583_v36 = vmul.f32 1.442695, %v581_v34 }
 0x597   :  { %v598_v37 = vpop.permute.xlu0 %597  ;;  %v580_v39 = vpop.xlane.xlu1 %579 }
 0x598   :  { %1760 = vpow2.f32 %v583_v36  ;;  %v603_v40 = vsel %vm376_vm3, %v598_v37, 0  ;;  %v582_v41 = vsub.f32 %v569_v27, %v580_v39 }
 0x599   :  { %1629 = vmatpush3.bf16.msra.mxu1 %v603_v40 }
 0x59a   :  { %v585_v42 = vmul.f32 1.442695, %v582_v41  ;;  %1640 = vmatprep.subr.bf16.mxu1 %v1976_v15 }
 0x59b   :  { %v715_v44 = vpop.permute.xlu0 %714  ;;  %v765_v45 = vpop.permute.xlu1 %764 }
 0x59c   :  { %1762 = vpow2.f32 %v585_v42  ;;  %v720_v47 = vsel %vm254_vm2, %v715_v44, 0  ;;  %v770_v51 = vsel %vm254_vm2, %v765_v45, 0 }
 0x59f   :  { %v763_v50 = vpop.permute.xlu1 %762  ;;  %v713_v52 = vpop.permute.xlu0 %712 }
 0x5a3   :  { %v883_v53 = vpop.permute.xlu1 %882 }
 0x5a4   :  { %v888_v54 = vsel %vm376_vm3, %v883_v53, 0 }
 0x5a5   :  { %v2193_v43 = vpop.eup %1760 }
 0x5a6   :  { %v595_v46 = vpack.c.bf16 %v2193_v43, %v2193_v43 }
 0x5a8   :  { %1631 = vmatmul.mubr.msk.bf16.vlgmr.msra.gmra.mxu1 %vm254_vm2, %v595_v46 }
 0x5a9   :  { %v2199_v48 = vpop.eup %1762  ;;  %1641 = vmatpush3.bf16.xpose.msra.mxu1 %v720_v47  ;;  %1642 = vmatprep.mubr.msk.bf16.mxu1 %vm1977_vm1, %v1976_v15 }
 0x5aa   :  { %v596_v49 = vpack.c.bf16 %v2199_v48, %v2199_v48  ;;  %1652 = vmatprep.subr.bf16.mxu1 %v1976_v15 }
 0x5ac   :  { %1637 = vmatmul.mubr.msk.bf16.vlgmr.msra.gmra.mxu0 %vm254_vm2, %v596_v49 }
 0x5ad   :  { %1647 = vmatpush3.bf16.xpose.msra.mxu0 %v770_v51  ;;  %1648 = vmatprep.mubr.msk.bf16.mxu0 %vm1977_vm1, %v1976_v15 }
 0x5ae   :  { %1658 = vmatprep.subr.bf16.mxu0 %v1976_v15 }
 0x5b0   :  { %1643 = vmatmul.mubr.msk.bf16.vlgmr.msra.gmra.mxu1 %vm254_vm2, %v713_v52 }
 0x5b1   :  { %1654 = vmatprep.mubr.msk.bf16.mxu1 %vm1977_vm1, %v1976_v15 }
 0x5b4   :  { %1649 = vmatmul.mubr.msk.bf16.vlgmr.msra.gmra.mxu0 %vm254_vm2, %v763_v50 }
 0x5b5   :  { %1659 = vmatpush3.bf16.msra.mxu0 %v888_v54  ;;  %1660 = vmatprep.mubr.msk.bf16.mxu0 %vm1977_vm1, %v1976_v15 }
 0x5b6   :  { %1670 = vmatprep.subr.bf16.mxu0 %v1976_v15 }
 0x668   :  { %v2219_v55 = vpop.f32.mrf.mxu1 }
 0x66a   :  { %v1632_v56 = vpop.f32.mrf.mxu1 }
 0x66c   :  { %v642_v57 = vpop.f32.mrf.mxu1  ;;  %v2221_v58 = vpop.f32.mrf.mxu0 }
 0x66d   :  { %v587_v57 = vsel %vm254_vm2, %v2193_v43, 0.0 }
 0x66e   :  { %v1633_v59 = vpop.f32.mrf.mxu1  ;;  %v1638_v60 = vpop.f32.mrf.mxu0 }
 0x66f   :  { %v590_v60 = vsel %vm254_vm2, %v2199_v48, 0.0 }
 0x670   :  { %v690_v61 = vpop.f32.mrf.mxu0  ;;  %v756_v62 = vpop.f32.mrf.mxu1 }
 0x671   :  { %v812_v63 = vsel %vm254_vm2, %v756_v62, -inf }
 0x672   :  { %813 = vmax.xlane.f32.xlu0 %v812_v63  ;;  %v1639_v2 = vpop.f32.mrf.mxu0  ;;  %v1644_v4 = vpop.f32.mrf.mxu1 }
 0x674   :  { %v759_v5 = vpop.f32.mrf.mxu1  ;;  %v806_v6 = vpop.f32.mrf.mxu0 }
 0x675   :  { %v815_v8 = vsel %vm254_vm2, %v806_v6, -inf }
 0x676   :  { %v1645_v9 = vpop.f32.mrf.mxu1  ;;  %816 = vmax.xlane.f32.xlu1 %v815_v8  ;;  %v1650_v10 = vpop.f32.mrf.mxu0 }
 0x678   :  { %v809_v11 = vpop.f32.mrf.mxu0 }
 0x67a   :  { %v1651_v12 = vpop.f32.mrf.mxu0 }
 0x67b   :  { %v361_v12 = vsel %vm254_vm2, %v2151_v3, 0.0 }
 0x687   :  { %1001 = vrot.lane.b32.xlu1 %v2120_v38, %s1985_s1 }
 0x688   :  { %834 = vrot.lane.b32.xlu0 %v2117_v35, %s1984_s17 }
 0x68b   :  { %999 = vrot.lane.b32.xlu1 %v2120_v38, %s1986_s18 }
 0x68c   :  { %951 = vrot.lane.b32.xlu0 %v2117_v35, %s1985_s1 }
 0x690   :  { %949 = vrot.lane.b32.xlu0 %v2117_v35, %s1986_s18 }
 0x6fb   :  { %v814_v13 = vpop.xlane.xlu0 %813 }
 0x6fc   :  { %v818_v16 = vsub.f32 %v756_v62, %v814_v13 }
 0x6fe   :  { %v820_v17 = vmul.f32 1.442695, %v818_v16 }
 0x6ff   :  { %v835_v19 = vpop.permute.xlu0 %834  ;;  %v817_v20 = vpop.xlane.xlu1 %816 }
 0x700   :  { %1764 = vpow2.f32 %v820_v17  ;;  %v840_v21 = vsel %vm376_vm3, %v835_v19, 0  ;;  %v819_v22 = vsub.f32 %v806_v6, %v817_v20  ;;  %v364_v17 = vsel %vm254_vm2, %v2157_v7, 0.0 }
 0x701   :  { %1653 = vmatpush3.bf16.msra.mxu1 %v840_v21 }
 0x702   :  { %v822_v23 = vmul.f32 1.442695, %v819_v22  ;;  %1664 = vmatprep.subr.bf16.mxu1 %v1976_v15 }
 0x703   :  { %v952_v25 = vpop.permute.xlu0 %951  ;;  %v1002_v29 = vpop.permute.xlu1 %1001 }
 0x704   :  { %1766 = vpow2.f32 %v822_v23  ;;  %v957_v27 = vsel %vm254_vm2, %v952_v25, 0  ;;  %v1007_v31 = vsel %vm254_vm2, %v1002_v29, 0 }
 0x707   :  { %v950_v32 = vpop.permute.xlu0 %949  ;;  %v1000_v33 = vpop.permute.xlu1 %999 }
 0x70d   :  { %v1765_v24 = vpop.eup %1764 }
 0x70e   :  { %v832_v26 = vpack.c.bf16 %v1765_v24, %v1765_v24  ;;  %v824_v59 = vsel %vm254_vm2, %v1765_v24, 0.0 }
 0x710   :  { %1655 = vmatmul.mubr.msk.bf16.vlgmr.msra.gmra.mxu1 %vm254_vm2, %v832_v26 }
 0x711   :  { %v1767_v28 = vpop.eup %1766  ;;  %1665 = vmatpush3.bf16.xpose.msra.mxu1 %v957_v27  ;;  %1666 = vmatprep.mubr.msk.bf16.mxu1 %vm1977_vm1, %v1976_v15 }
 0x712   :  { %v833_v30 = vpack.c.bf16 %v1767_v28, %v1767_v28  ;;  %1676 = vmatprep.subr.bf16.mxu1 %v1976_v15  ;;  %v827_v61 = vsel %vm254_vm2, %v1767_v28, 0.0 }
 0x714   :  { %1661 = vmatmul.mubr.msk.bf16.vlgmr.msra.gmra.mxu0 %vm254_vm2, %v833_v30 }
 0x715   :  { %1671 = vmatpush3.bf16.xpose.msra.mxu0 %v1007_v31  ;;  %1672 = vmatprep.mubr.msk.bf16.mxu0 %vm1977_vm1, %v1976_v15 }
 0x716   :  { %1682 = vmatprep.subr.bf16.mxu0 %v1976_v15 }
 0x718   :  { %1667 = vmatmul.mubr.msk.bf16.vlgmr.msra.gmra.mxu1 %vm254_vm2, %v950_v32 }
 0x719   :  { %1678 = vmatprep.mubr.msk.bf16.mxu1 %vm1977_vm1, %v1976_v15 }
 0x71c   :  { %1673 = vmatmul.mubr.msk.bf16.vlgmr.msra.gmra.mxu0 %vm254_vm2, %v1000_v33 }
 0x71d   :  { %1684 = vmatprep.mubr.msk.bf16.mxu0 %vm1977_vm1, %v1976_v15 }
 0x7d0   :  { %v2249_v34 = vpop.f32.mrf.mxu1 }
 0x7d2   :  { %v1656_v36 = vpop.f32.mrf.mxu1 }
 0x7d4   :  { %v879_v37 = vpop.f32.mrf.mxu1  ;;  %v2251_v39 = vpop.f32.mrf.mxu0 }
 0x7d6   :  { %v1657_v40 = vpop.f32.mrf.mxu1  ;;  %v1662_v41 = vpop.f32.mrf.mxu0 }
 0x7d8   :  { %v927_v42 = vpop.f32.mrf.mxu0  ;;  %v993_v44 = vpop.f32.mrf.mxu1 }
 0x7d9   :  { %v1049_v45 = vsel %vm254_vm2, %v993_v44, -inf }
 0x7da   :  { %1050 = vmax.xlane.f32.xlu0 %v1049_v45  ;;  %v1663_v46 = vpop.f32.mrf.mxu0  ;;  %v1668_v47 = vpop.f32.mrf.mxu1 }
 0x7dc   :  { %v996_v49 = vpop.f32.mrf.mxu1  ;;  %v1043_v50 = vpop.f32.mrf.mxu0 }
 0x7dd   :  { %v1052_v51 = vsel %vm254_vm2, %v1043_v50, -inf }
 0x7de   :  { %v1669_v52 = vpop.f32.mrf.mxu1  ;;  %1053 = vmax.xlane.f32.xlu1 %v1052_v51  ;;  %v1674_v53 = vpop.f32.mrf.mxu0 }
 0x7e0   :  { %v1046_v54 = vpop.f32.mrf.mxu0 }
 0x7e2   :  { %v1675_v56 = vpop.f32.mrf.mxu0 }
 0x7ef   :  { %1119 = vrot.lane.b32.xlu1 %v2120_v38, %s1987_s19 }
 0x7f0   :  { %1071 = vrot.lane.b32.xlu0 %v2117_v35, %s1987_s19 }
 0x80f   :  { %588 = vadd.xlane.f32.xlu0 %v587_v57 }
 0x813   :  { %825 = vadd.xlane.f32.xlu0 %v824_v59  ;;  %591 = vadd.xlane.f32.xlu1 %v590_v60 }
 0x817   :  { %828 = vadd.xlane.f32.xlu0 %v827_v61 }
 0x863   :  { %v1051_v62 = vpop.xlane.xlu0 %1050 }
 0x864   :  { %v1055_v63 = vsub.f32 %v993_v44, %v1051_v62 }
 0x866   :  { %v1057_v2 = vmul.f32 1.442695, %v1055_v63 }
 0x867   :  { %v1072_v38 = vpop.permute.xlu0 %1071  ;;  %v1054_v4 = vpop.xlane.xlu1 %1053 }
 0x868   :  { %1768 = vpow2.f32 %v1057_v2  ;;  %v1077_v35 = vsel %vm376_vm3, %v1072_v38, 0  ;;  %v1056_v43 = vsub.f32 %v1043_v50, %v1054_v4 }
 0x869   :  { %1677 = vmatpush3.bf16.msra.mxu1 %v1077_v35 }
 0x86a   :  { %v1059_v5 = vmul.f32 1.442695, %v1056_v43  ;;  %1688 = vmatprep.subr.bf16.mxu1 %v1976_v15 }
 0x86b   :  { %v1120_v6 = vpop.permute.xlu1 %1119 }
 0x86c   :  { %1770 = vpow2.f32 %v1059_v5  ;;  %v1125_v48 = vsel %vm376_vm3, %v1120_v6, 0  ;;  %v1517_v5 = vld [vmem:[#allocation7] ss:$0 sm:$0xff] }
 0x86d   :  { %1683 = vmatpush3.bf16.msra.mxu0 %v1125_v48 }
 0x86e   :  { %1696 = vmatprep.subr.bf16.mxu0 %v1976_v15 }
 0x875   :  { %v1769_v8 = vpop.eup %1768 }
 0x876   :  { %v1061_v9 = vsel %vm254_vm2, %v1769_v8, 0.0  ;;  %v1069_v10 = vpack.c.bf16 %v1769_v8, %v1769_v8 }
 0x877   :  { %1062 = vadd.xlane.f32.xlu0 %v1061_v9 }
 0x878   :  { %1679 = vmatmul.mubr.msk.bf16.vlgmr.msra.gmra.mxu1 %vm254_vm2, %v1069_v10 }
 0x879   :  { %v1771_v11 = vpop.eup %1770  ;;  %1692 = vmatprep.mubr.msk.bf16.mxu1 %vm1977_vm1, %v1976_v15 }
 0x87a   :  { %v1064_v13 = vsel %vm254_vm2, %v1771_v11, 0.0  ;;  %v1070_v16 = vpack.c.bf16 %v1771_v11, %v1771_v11 }
 0x87b   :  { %362 = vadd.xlane.f32.xlu0 %v361_v12  ;;  %1065 = vadd.xlane.f32.xlu1 %v1064_v13 }
 0x87c   :  { %1685 = vmatmul.mubr.msk.bf16.vlgmr.msra.gmra.mxu0 %vm254_vm2, %v1070_v16 }
 0x87d   :  { %1700 = vmatprep.mubr.msk.bf16.mxu0 %vm1977_vm1, %v1976_v15 }
 0x87f   :  { %365 = vadd.xlane.f32.xlu1 %v364_v17 }
 0x898   :  { %v589_v19 = vpop.xlane.xlu0 %588 }
 0x899   :  { %1772 = vrcp.f32 %v589_v19 }
 0x89c   :  { %v826_v20 = vpop.xlane.xlu0 %825  ;;  %v592_v21 = vpop.xlane.xlu1 %591 }
 0x89d   :  { %1774 = vrcp.f32 %v826_v20 }
 0x89e   :  { %1776 = vrcp.f32 %v592_v21 }
 0x8a0   :  { %v829_v3 = vpop.xlane.xlu0 %828 }
 0x8a1   :  { %1778 = vrcp.f32 %v829_v3 }
 0x8a6   :  { %v1773_v22 = vpop.eup %1772 }
 0x8a7   :  { %v693_v23 = vmul.f32 %v1773_v22, %v2219_v55 }
 0x8a9   :  { %v1532_v24 = vpack.c.bf16 %v693_v23, %v693_v23 }
 0x8aa   :  { %v1775_v25 = vpop.eup %1774 }
 0x8ab   :  { %v1777_v26 = vpop.eup %1776  ;;  %703 = vrot.lane.b32.xlu0 %v1532_v24, %s1988_s20  ;;  %v930_v28 = vmul.f32 %v1775_v25, %v2249_v34  ;;  %v1746_v25 = vld [vmem:[#allocation11 + $0x8] sm:$0xff]  }
 0x8ac   :  { %v694_v27 = vmul.f32 %v1777_v26, %v2221_v58  ;;  %1697 = vmatpush3.bf16.msra.mxu0 %v1746_v25  ;;  %v1747_v26 = vld [vmem:[#allocation11] sm:$0xff]  }
 0x8ad   :  { %v1534_v30 = vpack.c.bf16 %v930_v28, %v930_v28  ;;  %1698 = vmatprep.subr.bf16.mxu0 %v1976_v15 }
 0x8ae   :  { %v1533_v7 = vpack.c.bf16 %v694_v27, %v694_v27  ;;  %v1779_v29 = vpop.eup %1778 }
 0x8af   :  { %v931_v31 = vmul.f32 %v1779_v29, %v2251_v39 }
 0x8b0   :  { %705 = vrot.lane.b32.xlu1 %v1533_v7, %s1988_s20  ;;  %1699 = vmatpush3.bf16.msra.mxu0 %v1747_v26 }
 0x8b1   :  { %v1535_v32 = vpack.c.bf16 %v931_v31, %v931_v31 }
 0x8b4   :  { %940 = vrot.lane.b32.xlu1 %v1534_v30, %s1989_s5 }
 0x8b8   :  { %942 = vrot.lane.b32.xlu1 %v1535_v32, %s1989_s5 }
 0x900   :  { %v1063_v55 = vpop.xlane.xlu0 %1062 }
 0x904   :  { %v363_v33 = vpop.xlane.xlu0 %362  ;;  %v1066_v36 = vpop.xlane.xlu1 %1065 }
 0x905   :  { %1780 = vrcp.f32 %v363_v33  ;;  %v1518_v33 = vld [vmem:[#allocation8] ss:$0 sm:$0xff] }
 0x908   :  { %v366_v37 = vpop.xlane.xlu1 %365 }
 0x909   :  { %1782 = vrcp.f32 %v366_v37 }
 0x90a   :  { %1784 = vrcp.f32 %v1063_v55 }
 0x90b   :  { %1786 = vrcp.f32 %v1066_v36 }
 0x912   :  { %v1781_v40 = vpop.eup %1780 }
 0x913   :  { %v468_v58 = vmul.f32 %v1781_v40, %v2177_v14  ;;  %v1743_v14 = vld [vmem:[%s2341_s4 + $0x8] sm:$0xff]  }
 0x914   :  { %1689 = vmatpush3.bf16.msra.mxu1 %v1743_v14  ;;  %v1520_v14 = vld [vmem:[#allocation13] ss:$0 sm:$0xff] }
 0x915   :  { %v470_v34 = vpack.c.bf16 %v468_v58, %v468_v58  ;;  %1690 = vmatprep.subr.bf16.mxu1 %v1976_v15  ;;  %v1519_v58 = vld [vmem:[#allocation10] ss:$0 sm:$0xff] }
 0x916   :  { %v1783_v41 = vpop.eup %1782 }
 0x917   :  { %473 = vst.msk [vmem:[#allocation2] sm:$0xf] %vm472_vm4, %v470_v34  ;;  %v469_v42 = vmul.f32 %v1783_v41, %v2179_v18  ;;  %v1744_v18 = vld [vmem:[%s2341_s4] sm:$0xff]   ;;  %v1785_v49 = vpop.eup %1784 }
 0x918   :  { %1691 = vmatpush3.bf16.msra.mxu1 %v1744_v18  ;;  %v1787_v54 = vpop.eup %1786 }
 0x919   :  { %v471_v39 = vpack.c.bf16 %v469_v42, %v469_v42  ;;  %1704 = vmatprep.subr.bf16.mxu1 %v1976_v15 }
 0x91b   :  { %474 = vst.msk [vmem:[#allocation2 + $0x4] sm:$0xf] %vm472_vm4, %v471_v39 }
 0x91d   :  { %v704_v44 = vpop.permute.xlu0 %703 }
 0x91e   :  { %710 = vst.msk [vmem:[#allocation2] sm:$0xf] %vm709_vm5, %v704_v44  ;;  %v1748_v44 = vld [vmem:[%s2347_s10 + $0x18] sm:$0xff]  }
 0x922   :  { %v706_v45 = vpop.permute.xlu1 %705 }
 0x923   :  { %711 = vst.msk [vmem:[#allocation2 + $0x4] sm:$0xf] %vm709_vm5, %v706_v45  ;;  %v1749_v45 = vld [vmem:[%s2347_s10 + $0x10] sm:$0xff]  }
 0x926   :  { %v941_v46 = vpop.permute.xlu1 %940 }
 0x927   :  { %947 = vst.msk [vmem:[#allocation2] sm:$0xf] %vm946_vm6, %v941_v46  ;;  %v1750_v46 = vld [vmem:[%s2347_s10 + $0x8] sm:$0xff]  }
 0x92a   :  { %v943_v47 = vpop.permute.xlu1 %942 }
 0x92b   :  { %948 = vst.msk [vmem:[#allocation2 + $0x4] sm:$0xf] %vm946_vm6, %v943_v47  ;;  %v1751_v47 = vld [vmem:[%s2347_s10] sm:$0xff]  }
 0x938   :  { %v1113_v50 = vpop.f32.mrf.mxu1 }
 0x939   :  { %v1167_v51 = vmul.f32 %v1785_v49, %v1113_v50 }
 0x93a   :  { %v1680_v52 = vpop.f32.mrf.mxu1 }
 0x93b   :  { %v1536_v53 = vpack.c.bf16 %v1167_v51, %v1167_v51 }
 0x93c   :  { %v1116_v56 = vpop.f32.mrf.mxu1  ;;  %v1161_v57 = vpop.f32.mrf.mxu0 }
 0x93d   :  { %v1168_v59 = vmul.f32 %v1787_v54, %v1161_v57  ;;  %1177 = vrot.lane.b32.xlu0 %v1536_v53, %s1990_s24 }
 0x93e   :  { %v1681_v60 = vpop.f32.mrf.mxu1  ;;  %v1686_v61 = vpop.f32.mrf.mxu0 }
 0x93f   :  { %v1537_v62 = vpack.c.bf16 %v1168_v59, %v1168_v59 }
 0x940   :  { %v1164_v63 = vpop.f32.mrf.mxu0 }
 0x941   :  { %1179 = vrot.lane.b32.xlu1 %v1537_v62, %s1990_s24 }
 0x942   :  { %v1687_v2 = vpop.f32.mrf.mxu0 }
 0x9af   :  { %v1178_v38 = vpop.permute.xlu0 %1177 }
 0x9b0   :  { %1184 = vst.msk [vmem:[#allocation2] sm:$0xf] %vm1183_vm7, %v1178_v38 }
 0x9b3   :  { %v1180_v4 = vpop.permute.xlu1 %1179 }
 0x9b4   :  { %1185 = vst.msk [vmem:[#allocation2 + $0x4] sm:$0xf] %vm1183_vm7, %v1180_v4  ;;  %v1524_v4 = vld [vmem:[#allocation14] ss:$0 sm:$0xff] }
 0x9bb   :  { %v1745_v35 = vld [vmem:[#allocation2] sm:$0xff]  }
 0x9bc   :  { %1693 = vmatmul.mubr.msk.bf16.vlgmr.msra.gmra.mxu1 %vm141_vm0, %v1745_v35 }
 0x9bd   :  { %1712 = vmatprep.mubr.msk.bf16.mxu1 %vm1977_vm1, %v1976_v15  ;;  %1705 = vmatpush3.bf16.msra.mxu1 %v1748_v44 }
 0x9be   :  { %1706 = vmatprep.subr.bf16.mxu1 %v1976_v15 }
 0x9c1   :  { %1707 = vmatpush3.bf16.msra.mxu1 %v1749_v45 }
 0x9c2   :  { %1708 = vmatprep.subr.bf16.mxu1 %v1976_v15 }
 0x9c5   :  { %1709 = vmatpush3.bf16.msra.mxu1 %v1750_v46 }
 0x9c6   :  { %1710 = vmatprep.subr.bf16.mxu1 %v1976_v15 }
 0x9c9   :  { %1711 = vmatpush3.bf16.msra.mxu1 %v1751_v47 }
 0xa7c   :  { %v1246_v43 = vpop.f32.mrf.mxu1 }
 0xa7d   :  { %v1253_v6 = vadd.f32 %v1246_v43, %v2085_v0 }
 0xa7e   :  { %v1694_v48 = vpop.f32.mrf.mxu1 }
 0xa7f   :  { %v2297_v8 = vadd.f32 %v1517_v5, %v1253_v6 }
 0xa80   :  { %v1249_v9 = vpop.f32.mrf.mxu1 }
 0xa81   :  { %v1254_v10 = vadd.f32 %v1249_v9, %v2090_v1  ;;  %v1266_v11 = vsel %vm141_vm0, %v2297_v8, 0.0 }
 0xa82   :  { %1267 = vadd.xlane.f32.xlu0 %v1266_v11  ;;  %v1695_v12 = vpop.f32.mrf.mxu1 }
 0xa83   :  { %v2302_v13 = vadd.f32 %v1517_v5, %v1254_v10 }
 0xa85   :  { %v1269_v16 = vsel %vm141_vm0, %v2302_v13, 0.0 }
 0xa86   :  { %1270 = vadd.xlane.f32.xlu1 %v1269_v16 }
 0xb0b   :  { %v1268_v17 = vpop.xlane.xlu0 %1267 }
 0xb0c   :  { %v1272_v19 = vmul.f32 0.03125, %v1268_v17 }
 0xb0e   :  { %v1274_v0 = vsub.f32 %v2297_v8, %v1272_v19 }
 0xb0f   :  { %v1271_v20 = vpop.xlane.xlu1 %1270 }
 0xb10   :  { %v1273_v21 = vmul.f32 0.03125, %v1271_v20  ;;  %v1276_v3 = vmul.f32 %v1274_v0, %v1274_v0 }
 0xb12   :  { %v1275_v1 = vsub.f32 %v2302_v13, %v1273_v21  ;;  %v1278_v22 = vsel %vm141_vm0, %v1276_v3, 0.0 }
 0xb13   :  { %1279 = vadd.xlane.f32.xlu0 %v1278_v22 }
 0xb14   :  { %v1277_v23 = vmul.f32 %v1275_v1, %v1275_v1 }
 0xb16   :  { %v1281_v24 = vsel %vm141_vm0, %v1277_v23, 0.0 }
 0xb17   :  { %1282 = vadd.xlane.f32.xlu0 %v1281_v24 }
 0xb9c   :  { %v1280_v27 = vpop.xlane.xlu0 %1279 }
 0xb9d   :  { %v1284_v7 = vmul.f32 0.03125, %v1280_v27 }
 0xb9f   :  { %v1286_v28 = vadd.f32 1e-05, %v1284_v7 }
 0xba0   :  { %v1283_v29 = vpop.xlane.xlu0 %1282 }
 0xba1   :  { %1788 = vrsqrt.f32 %v1286_v28  ;;  %v1285_v30 = vmul.f32 0.03125, %v1283_v29 }
 0xba3   :  { %v1287_v31 = vadd.f32 1e-05, %v1285_v30 }
 0xba5   :  { %1790 = vrsqrt.f32 %v1287_v31 }
 0xbae   :  { %v1789_v32 = vpop.eup %1788 }
 0xbaf   :  { %v1290_v55 = vmul.f32 %v1789_v32, %v1274_v0 }
 0xbb1   :  { %v1298_v40 = vmul.f32 %v1518_v33, %v1290_v55 }
 0xbb2   :  { %v1791_v36 = vpop.eup %1790 }
 0xbb3   :  { %v1291_v37 = vmul.f32 %v1791_v36, %v1275_v1  ;;  %v1306_v41 = vadd.f32 %v1519_v58, %v1298_v40 }
 0xbb5   :  { %v1299_v34 = vmul.f32 %v1518_v33, %v1291_v37 }
 0xbb7   :  { %v1307_v42 = vadd.f32 %v1519_v58, %v1299_v34 }
 0xbb9   :  { %v1308_v39 = vpack.c.bf16 %v1307_v42, %v1306_v41 }
 0xbbb   :  { %1701 = vmatmul.mubr.msk.bf16.vlgmr.msra.gmra.mxu0 %vm141_vm0, %v1308_v39 }
 0xc7b   :  { %v1369_v18 = vpop.f32.mrf.mxu0 }
 0xc7c   :  { %v1370_v49 = vadd.f32 %v1520_v14, %v1369_v18 }
 0xc7d   :  { %v1702_v50 = vpop.f32.mrf.mxu0 }
 0xc7e   :  { %v1378_v51 = vmul.f32 0.70710677, %v1370_v49  ;;  %v1376_v15 = vmul.f32 0.5, %v1370_v49 }
 0xc7f   :  { %v1372_v52 = vpop.f32.mrf.mxu0 }
 0xc80   :  { %1792 = verf.f32 %v1378_v51  ;;  %v1373_v53 = vadd.f32 %v1520_v14, %v1372_v52 }
 0xc81   :  { %v1703_v54 = vpop.f32.mrf.mxu0 }
 0xc82   :  { %v1379_v56 = vmul.f32 0.70710677, %v1373_v53  ;;  %v1377_v61 = vmul.f32 0.5, %v1373_v53 }
 0xc84   :  { %1794 = verf.f32 %v1379_v56 }
 0xc8d   :  { %v1793_v57 = vpop.eup %1792 }
 0xc8e   :  { %v1382_v59 = vadd.f32 1.0, %v1793_v57 }
 0xc90   :  { %v1384_v63 = vmul.f32 %v1382_v59, %v1376_v15 }
 0xc91   :  { %v1795_v60 = vpop.eup %1794 }
 0xc92   :  { %v1383_v62 = vadd.f32 1.0, %v1795_v60 }
 0xc94   :  { %v1385_v2 = vmul.f32 %v1383_v62, %v1377_v61 }
 0xc96   :  { %v1386_v38 = vpack.c.bf16 %v1385_v2, %v1384_v63 }
 0xc98   :  { %1713 = vmatmul.mubr.msk.bf16.vlgmr.msra.gmra.mxu1 %vm1426_vm8, %v1386_v38 }
 0xd58   :  { %v1464_v35 = vpop.f32.mrf.mxu1 }
 0xd59   :  { %v1465_v43 = vadd.f32 %v1524_v4, %v1464_v35 }
 0xd5a   :  { %v1714_v5 = vpop.f32.mrf.mxu1 }
 0xd5b   :  { %v1471_v6 = vadd.f32 %v1465_v43, %v2297_v8 }
 0xd5c   :  { %v1467_v48 = vpop.f32.mrf.mxu1 }
 0xd5d   :  { %1473 = vst.msk [vmem:[%s2349_s12] sm:$0xff] %vm141_vm0, %v1471_v6  ;;  %v1468_v9 = vadd.f32 %v1524_v4, %v1467_v48 }
 0xd5e   :  { %v1715_v10 = vpop.f32.mrf.mxu1 }
 0xd5f   :  { %v1472_v11 = vadd.f32 %v1468_v9, %v2302_v13 }
 0xd61   :  { %1474 = vst.msk [vmem:[%s2349_s12 + $0x8] sm:$0xff] %vm141_vm0, %v1472_v11 }
 0xd62   :  { %1479 = vsyncpa [#allocation4], 1 }
 0xd63   :  { %1480 = vsyncpa [#allocation6], 1 }
 0xd64   :  { %1481 = vsyncpa [#allocation9], 1 }
 0xd65   :  { %1482 = vsyncpa [#allocation12], 1 }
 0xd66   :  { %1483 = vsyncpa [#allocation15], 1 }

// kernel: transformer_encoder.3
= control target key start
LH: loop header
LB: loop body
LE: loop exit
PB: predicated region body
PF: predicated region fallthrough
CT: control target
= control target key end

     0   :  { %vm47_vm0 = vcmask 261120   ;;  %s2087_s0 = inlined_call_operand.vmem [shape: f32[2,8,32], index: 0, kind: input, shape index: {}]   ;;  %s2088_s1 = inlined_call_operand.vmem [shape: f32[1,32], index: 1, kind: input, shape index: {}]   ;;  %s2089_s2 = inlined_call_operand.vmem [shape: f32[1,32], index: 2, kind: input, shape index: {}]   ;;  %s2090_s3 = inlined_call_operand.vmem [shape: bf16[32,96], index: 3, kind: input, shape index: {}]   ;;  %s2091_s4 = inlined_call_operand.vmem [shape: bf16[32,32], index: 4, kind: input, shape index: {}]   ;;  %s2092_s5 = inlined_call_operand.vmem [shape: f32[1,32], index: 5, kind: input, shape index: {}]   ;;  %s2093_s6 = inlined_call_operand.vmem [shape: f32[1,32], index: 6, kind: input, shape index: {}]   ;;  %s2094_s7 = inlined_call_operand.vmem [shape: f32[1,32], index: 7, kind: input, shape index: {}]   ;;  %s2095_s8 = inlined_call_operand.vmem [shape: bf16[32,64], index: 8, kind: input, shape index: {}]   ;;  %s2096_s9 = inlined_call_operand.vmem [shape: f32[1,64], index: 9, kind: input, shape index: {}]   ;;  %s2097_s10 = inlined_call_operand.vmem [shape: bf16[64,32], index: 10, kind: input, shape index: {}]   ;;  %s2098_s11 = inlined_call_operand.vmem [shape: f32[1,32], index: 11, kind: input, shape index: {}]   ;;  %s2099_s12 = inlined_call_operand.hbm [shape: f32[2,8,32], index: 12, kind: output, shape index: {}]  }
   0x1   :  { %v1810_v0 = vld [vmem:[%s2087_s0] sm:$0xff]  ;;  %v1815_v1 = vld [vmem:[%s2087_s0 + $0x8] sm:$0xff] }
   0x2   :  { %v48_v2 = vsel %vm47_vm0, %v1810_v0, 0.0  ;;  %v51_v3 = vsel %vm47_vm0, %v1815_v1, 0.0 }
   0x3   :  { %49 = vadd.xlane.f32.xlu0 %v48_v2 }
   0x7   :  { %52 = vadd.xlane.f32.xlu0 %v51_v3 }
   0x8   :  { %17 = vsyncpa [#allocation4], 0  ;;  %v1647_v14 = vld [vmem:[%s2090_s3 + $0x8] sm:$0xff]   ;;  %v1724_v15 = vmov 0.0   ;;  %vm1725_vm1 = vmmov 0   ;;  %v1648_v16 = vld [vmem:[%s2090_s3] sm:$0xff]  }
   0x9   :  { %1497 = vmatprep.subr.bf16.mxu0 %v1724_v15  ;;  %1501 = vmatprep.mubr.msk.bf16.mxu0 %vm1725_vm1, %v1724_v15  ;;  %v1397_v25 = vld [vmem:[%s2088_s1] ss:$0 sm:$0xff]  ;;  %s1726_s1 = smov 96   ;;  %vm160_vm2 = vcmask 64512   ;;  %s1728_s13 = smov 88   ;;  %vm282_vm3 = vcmask 1043456  }
   0xa   :  { %1498 = vmatpush3.bf16.msra.mxu0 %v1647_v14  ;;  %1505 = vmatprep.subr.bf16.mxu1 %v1724_v15  ;;  %v1398_v29 = vld [vmem:[%s2089_s2] ss:$0 sm:$0xff]  ;;  %s1727_s2 = smov 64   ;;  %s1729_s14 = smov 120   ;;  %vm378_vm4 = vcmask 60416   ;;  %vm615_vm5 = vcmask 126016  }
   0xb   :  { %1499 = vmatprep.subr.bf16.mxu0 %v1724_v15  ;;  %1507 = vmatprep.mubr.msk.bf16.mxu1 %vm1725_vm1, %v1724_v15  ;;  %s1730_s15 = smov 56   ;;  %s1731_s16 = smov 80   ;;  %vm852_vm6 = vcmask 191616   ;;  %vm1089_vm7 = vcmask 257216   ;;  %vm1332_vm8 = vcmask 523264  }
   0xc   :  { %s1732_s17 = smov 112   ;;  %s1733_s18 = smov 48  }
   0xd   :  { %s1734_s19 = smov 72   ;;  %s1735_s20 = smov 104  }
   0xe   :  { %1500 = vmatpush3.bf16.msra.mxu0 %v1648_v16  ;;  %s1736_s21 = smov 40   ;;  %s1737_s22 = smov 8  }
   0xf   :  { %1511 = vmatprep.subr.bf16.mxu0 %v1724_v15  ;;  %s1738_s23 = smov 16   ;;  %s1739_s27 = smov 24  }
  0x8c   :  { %v50_v4 = vpop.xlane.xlu0 %49 }
  0x8d   :  { %v55_v5 = vmul.f32 0.03125, %v50_v4 }
  0x8f   :  { %v57_v6 = vsub.f32 %v1810_v0, %v55_v5 }
  0x90   :  { %v53_v7 = vpop.xlane.xlu0 %52 }
  0x91   :  { %v56_v8 = vmul.f32 0.03125, %v53_v7  ;;  %v59_v9 = vmul.f32 %v57_v6, %v57_v6 }
  0x93   :  { %v58_v10 = vsub.f32 %v1815_v1, %v56_v8  ;;  %v61_v11 = vsel %vm47_vm0, %v59_v9, 0.0 }
  0x94   :  { %62 = vadd.xlane.f32.xlu1 %v61_v11 }
  0x95   :  { %v60_v12 = vmul.f32 %v58_v10, %v58_v10 }
  0x97   :  { %v64_v13 = vsel %vm47_vm0, %v60_v12, 0.0 }
  0x98   :  { %65 = vadd.xlane.f32.xlu1 %v64_v13 }
 0x11d   :  { %v63_v17 = vpop.xlane.xlu1 %62 }
 0x11e   :  { %v67_v18 = vmul.f32 0.03125, %v63_v17 }
 0x120   :  { %v69_v19 = vadd.f32 1e-05, %v67_v18 }
 0x121   :  { %v66_v20 = vpop.xlane.xlu1 %65 }
 0x122   :  { %1658 = vrsqrt.f32 %v69_v19  ;;  %v68_v21 = vmul.f32 0.03125, %v66_v20 }
 0x124   :  { %v70_v22 = vadd.f32 1e-05, %v68_v21 }
 0x126   :  { %1660 = vrsqrt.f32 %v70_v22 }
 0x12f   :  { %v1659_v23 = vpop.eup %1658 }
 0x130   :  { %v73_v24 = vmul.f32 %v1659_v23, %v57_v6 }
 0x132   :  { %v81_v28 = vmul.f32 %v1397_v25, %v73_v24 }
 0x133   :  { %v1661_v26 = vpop.eup %1660 }
 0x134   :  { %v74_v27 = vmul.f32 %v1661_v26, %v58_v10  ;;  %v89_v31 = vadd.f32 %v1398_v29, %v81_v28 }
 0x136   :  { %v82_v30 = vmul.f32 %v1397_v25, %v74_v27 }
 0x138   :  { %v90_v32 = vadd.f32 %v1398_v29, %v82_v30 }
 0x13a   :  { %v91_v33 = vpack.c.bf16 %v90_v32, %v89_v31 }
 0x13c   :  { %1502 = vmatmul.mubr.msk.bf16.vlgmr.msra.gmra.mxu0 %vm47_vm0, %v91_v33 }
 0x13d   :  { %1513 = vmatprep.mubr.msk.bf16.mxu0 %vm1725_vm1, %v1724_v15 }
 0x1fc   :  { %v145_v34 = vpop.f32.mrf.mxu0 }
 0x1fd   :  { %v1848_v35 = vpack.c.bf16 %v145_v34, %v145_v34 }
 0x1fe   :  { %v1503_v36 = vpop.f32.mrf.mxu0 }
 0x1ff   :  { %158 = vrot.lane.b32.xlu0 %v1848_v35, %s1726_s1 }
 0x200   :  { %v148_v37 = vpop.f32.mrf.mxu0 }
 0x201   :  { %v1851_v38 = vpack.c.bf16 %v148_v37, %v148_v37 }
 0x202   :  { %v1504_v39 = vpop.f32.mrf.mxu0 }
 0x203   :  { %207 = vrot.lane.b32.xlu1 %v1851_v38, %s1726_s1 }
 0x271   :  { %v159_v40 = vpop.permute.xlu0 %158 }
 0x272   :  { %v165_v41 = vsel %vm160_vm2, %v159_v40, 0 }
 0x273   :  { %1506 = vmatpush3.bf16.xpose.msra.mxu1 %v165_v41 }
 0x274   :  { %1517 = vmatprep.subr.bf16.mxu1 %v1724_v15 }
 0x275   :  { %v208_v42 = vpop.permute.xlu1 %207 }
 0x276   :  { %v213_v43 = vsel %vm160_vm2, %v208_v42, 0 }
 0x277   :  { %1512 = vmatpush3.bf16.xpose.msra.mxu0 %v213_v43 }
 0x278   :  { %1523 = vmatprep.subr.bf16.mxu0 %v1724_v15 }
 0x27a   :  { %1508 = vmatmul.mubr.msk.bf16.vlgmr.msra.gmra.mxu1 %vm160_vm2, %v1848_v35 }
 0x27b   :  { %1519 = vmatprep.mubr.msk.bf16.mxu1 %vm1725_vm1, %v1724_v15 }
 0x27e   :  { %1514 = vmatmul.mubr.msk.bf16.vlgmr.msra.gmra.mxu0 %vm160_vm2, %v1851_v38 }
 0x27f   :  { %1525 = vmatprep.mubr.msk.bf16.mxu0 %vm1725_vm1, %v1724_v15 }
 0x33a   :  { %v201_v44 = vpop.f32.mrf.mxu1 }
 0x33b   :  { %v255_v45 = vsel %vm160_vm2, %v201_v44, -inf }
 0x33c   :  { %v1509_v46 = vpop.f32.mrf.mxu1  ;;  %256 = vmax.xlane.f32.xlu1 %v255_v45 }
 0x33e   :  { %v204_v47 = vpop.f32.mrf.mxu1  ;;  %v249_v48 = vpop.f32.mrf.mxu0 }
 0x33f   :  { %v258_v49 = vsel %vm160_vm2, %v249_v48, -inf }
 0x340   :  { %v1510_v50 = vpop.f32.mrf.mxu1  ;;  %259 = vmax.xlane.f32.xlu0 %v258_v49  ;;  %v1515_v51 = vpop.f32.mrf.mxu0 }
 0x342   :  { %v252_v52 = vpop.f32.mrf.mxu0 }
 0x344   :  { %v1516_v53 = vpop.f32.mrf.mxu0 }
 0x34d   :  { %326 = vrot.lane.b32.xlu1 %v1851_v38, %s1727_s2 }
 0x351   :  { %383 = vrot.lane.b32.xlu1 %v1848_v35, %s1728_s13 }
 0x355   :  { %433 = vrot.lane.b32.xlu1 %v1851_v38, %s1728_s13 }
 0x356   :  { %277 = vrot.lane.b32.xlu0 %v1848_v35, %s1727_s2 }
 0x359   :  { %431 = vrot.lane.b32.xlu1 %v1851_v38, %s1729_s14 }
 0x35a   :  { %381 = vrot.lane.b32.xlu0 %v1848_v35, %s1729_s14 }
 0x35d   :  { %551 = vrot.lane.b32.xlu1 %v1851_v38, %s1730_s15 }
 0x3c5   :  { %v257_v54 = vpop.xlane.xlu1 %256 }
 0x3c6   :  { %v261_v55 = vsub.f32 %v201_v44, %v257_v54 }
 0x3c8   :  { %v263_v56 = vmul.f32 1.442695, %v261_v55 }
 0x3c9   :  { %v327_v57 = vpop.permute.xlu1 %326  ;;  %v260_v58 = vpop.xlane.xlu0 %259 }
 0x3ca   :  { %1662 = vpow2.f32 %v263_v56  ;;  %v332_v59 = vsel %vm282_vm3, %v327_v57, 0  ;;  %v262_v60 = vsub.f32 %v249_v48, %v260_v58 }
 0x3cb   :  { %1524 = vmatpush3.bf16.msra.mxu0 %v332_v59 }
 0x3cc   :  { %v265_v61 = vmul.f32 1.442695, %v262_v60  ;;  %1535 = vmatprep.subr.bf16.mxu0 %v1724_v15 }
 0x3cd   :  { %v278_v62 = vpop.permute.xlu0 %277  ;;  %v384_v2 = vpop.permute.xlu1 %383 }
 0x3ce   :  { %1664 = vpow2.f32 %v265_v61  ;;  %v284_v63 = vsel %vm282_vm3, %v278_v62, 0  ;;  %v389_v6 = vsel %vm160_vm2, %v384_v2, 0 }
 0x3cf   :  { %1518 = vmatpush3.bf16.msra.mxu1 %v284_v63 }
 0x3d0   :  { %1529 = vmatprep.subr.bf16.mxu1 %v1724_v15 }
 0x3d1   :  { %v434_v4 = vpop.permute.xlu1 %433  ;;  %v382_v11 = vpop.permute.xlu0 %381 }
 0x3d2   :  { %v439_v10 = vsel %vm160_vm2, %v434_v4, 0 }
 0x3d5   :  { %v432_v9 = vpop.permute.xlu1 %431 }
 0x3d7   :  { %v1880_v3 = vpop.eup %1662 }
 0x3d8   :  { %v275_v5 = vpack.c.bf16 %v1880_v3, %v1880_v3 }
 0x3d9   :  { %v552_v12 = vpop.permute.xlu1 %551 }
 0x3da   :  { %1520 = vmatmul.mubr.msk.bf16.vlgmr.msra.gmra.mxu1 %vm160_vm2, %v275_v5  ;;  %v557_v13 = vsel %vm282_vm3, %v552_v12, 0 }
 0x3db   :  { %v1886_v7 = vpop.eup %1664  ;;  %1530 = vmatpush3.bf16.xpose.msra.mxu1 %v389_v6  ;;  %1531 = vmatprep.mubr.msk.bf16.mxu1 %vm1725_vm1, %v1724_v15 }
 0x3dc   :  { %v276_v8 = vpack.c.bf16 %v1886_v7, %v1886_v7  ;;  %1541 = vmatprep.subr.bf16.mxu1 %v1724_v15 }
 0x3de   :  { %1526 = vmatmul.mubr.msk.bf16.vlgmr.msra.gmra.mxu0 %vm160_vm2, %v276_v8 }
 0x3df   :  { %1536 = vmatpush3.bf16.xpose.msra.mxu0 %v439_v10  ;;  %1537 = vmatprep.mubr.msk.bf16.mxu0 %vm1725_vm1, %v1724_v15 }
 0x3e0   :  { %1547 = vmatprep.subr.bf16.mxu0 %v1724_v15 }
 0x3e2   :  { %1532 = vmatmul.mubr.msk.bf16.vlgmr.msra.gmra.mxu1 %vm160_vm2, %v382_v11 }
 0x3e3   :  { %1543 = vmatprep.mubr.msk.bf16.mxu1 %vm1725_vm1, %v1724_v15 }
 0x3e6   :  { %1538 = vmatmul.mubr.msk.bf16.vlgmr.msra.gmra.mxu0 %vm160_vm2, %v432_v9 }
 0x3e7   :  { %1548 = vmatpush3.bf16.msra.mxu0 %v557_v13  ;;  %1549 = vmatprep.mubr.msk.bf16.mxu0 %vm1725_vm1, %v1724_v15 }
 0x3e8   :  { %1559 = vmatprep.subr.bf16.mxu0 %v1724_v15 }
 0x49a   :  { %v1906_v14 = vpop.f32.mrf.mxu1 }
 0x49c   :  { %v1521_v16 = vpop.f32.mrf.mxu1 }
 0x49e   :  { %v323_v17 = vpop.f32.mrf.mxu1  ;;  %v1908_v18 = vpop.f32.mrf.mxu0 }
 0x4a0   :  { %v1522_v19 = vpop.f32.mrf.mxu1  ;;  %v1527_v20 = vpop.f32.mrf.mxu0 }
 0x4a2   :  { %v371_v21 = vpop.f32.mrf.mxu0  ;;  %v425_v22 = vpop.f32.mrf.mxu1 }
 0x4a3   :  { %v481_v23 = vsel %vm160_vm2, %v425_v22, -inf }
 0x4a4   :  { %482 = vmax.xlane.f32.xlu0 %v481_v23  ;;  %v1528_v24 = vpop.f32.mrf.mxu0  ;;  %v1533_v25 = vpop.f32.mrf.mxu1 }
 0x4a6   :  { %v428_v26 = vpop.f32.mrf.mxu1  ;;  %v475_v27 = vpop.f32.mrf.mxu0 }
 0x4a7   :  { %v484_v28 = vsel %vm160_vm2, %v475_v27, -inf }
 0x4a8   :  { %v1534_v29 = vpop.f32.mrf.mxu1  ;;  %485 = vmax.xlane.f32.xlu1 %v484_v28  ;;  %v1539_v30 = vpop.f32.mrf.mxu0 }
 0x4aa   :  { %v478_v31 = vpop.f32.mrf.mxu0 }
 0x4ac   :  { %v1540_v32 = vpop.f32.mrf.mxu0 }
 0x4b9   :  { %670 = vrot.lane.b32.xlu1 %v1851_v38, %s1731_s16 }
 0x4ba   :  { %503 = vrot.lane.b32.xlu0 %v1848_v35, %s1730_s15 }
 0x4bd   :  { %668 = vrot.lane.b32.xlu1 %v1851_v38, %s1732_s17 }
 0x4be   :  { %620 = vrot.lane.b32.xlu0 %v1848_v35, %s1731_s16 }
 0x4c1   :  { %788 = vrot.lane.b32.xlu1 %v1851_v38, %s1733_s18 }
 0x4c2   :  { %618 = vrot.lane.b32.xlu0 %v1848_v35, %s1732_s17 }
 0x52d   :  { %v483_v33 = vpop.xlane.xlu0 %482 }
 0x52e   :  { %v487_v34 = vsub.f32 %v425_v22, %v483_v33 }
 0x530   :  { %v489_v36 = vmul.f32 1.442695, %v487_v34 }
 0x531   :  { %v504_v37 = vpop.permute.xlu0 %503  ;;  %v486_v39 = vpop.xlane.xlu1 %485 }
 0x532   :  { %1666 = vpow2.f32 %v489_v36  ;;  %v509_v40 = vsel %vm282_vm3, %v504_v37, 0  ;;  %v488_v41 = vsub.f32 %v475_v27, %v486_v39 }
 0x533   :  { %1542 = vmatpush3.bf16.msra.mxu1 %v509_v40 }
 0x534   :  { %v491_v42 = vmul.f32 1.442695, %v488_v41  ;;  %1553 = vmatprep.subr.bf16.mxu1 %v1724_v15 }
 0x535   :  { %v621_v44 = vpop.permute.xlu0 %620  ;;  %v671_v45 = vpop.permute.xlu1 %670 }
 0x536   :  { %1668 = vpow2.f32 %v491_v42  ;;  %v626_v47 = vsel %vm160_vm2, %v621_v44, 0  ;;  %v676_v51 = vsel %vm160_vm2, %v671_v45, 0 }
 0x539   :  { %v669_v50 = vpop.permute.xlu1 %668  ;;  %v619_v52 = vpop.permute.xlu0 %618 }
 0x53d   :  { %v789_v53 = vpop.permute.xlu1 %788 }
 0x53e   :  { %v794_v54 = vsel %vm282_vm3, %v789_v53, 0 }
 0x53f   :  { %v1922_v43 = vpop.eup %1666 }
 0x540   :  { %v501_v46 = vpack.c.bf16 %v1922_v43, %v1922_v43 }
 0x542   :  { %1544 = vmatmul.mubr.msk.bf16.vlgmr.msra.gmra.mxu1 %vm160_vm2, %v501_v46 }
 0x543   :  { %v1928_v48 = vpop.eup %1668  ;;  %1554 = vmatpush3.bf16.xpose.msra.mxu1 %v626_v47  ;;  %1555 = vmatprep.mubr.msk.bf16.mxu1 %vm1725_vm1, %v1724_v15 }
 0x544   :  { %v502_v49 = vpack.c.bf16 %v1928_v48, %v1928_v48  ;;  %1565 = vmatprep.subr.bf16.mxu1 %v1724_v15 }
 0x546   :  { %1550 = vmatmul.mubr.msk.bf16.vlgmr.msra.gmra.mxu0 %vm160_vm2, %v502_v49 }
 0x547   :  { %1560 = vmatpush3.bf16.xpose.msra.mxu0 %v676_v51  ;;  %1561 = vmatprep.mubr.msk.bf16.mxu0 %vm1725_vm1, %v1724_v15 }
 0x548   :  { %1571 = vmatprep.subr.bf16.mxu0 %v1724_v15 }
 0x54a   :  { %1556 = vmatmul.mubr.msk.bf16.vlgmr.msra.gmra.mxu1 %vm160_vm2, %v619_v52 }
 0x54b   :  { %1567 = vmatprep.mubr.msk.bf16.mxu1 %vm1725_vm1, %v1724_v15 }
 0x54e   :  { %1562 = vmatmul.mubr.msk.bf16.vlgmr.msra.gmra.mxu0 %vm160_vm2, %v669_v50 }
 0x54f   :  { %1572 = vmatpush3.bf16.msra.mxu0 %v794_v54  ;;  %1573 = vmatprep.mubr.msk.bf16.mxu0 %vm1725_vm1, %v1724_v15 }
 0x550   :  { %1583 = vmatprep.subr.bf16.mxu0 %v1724_v15 }
 0x602   :  { %v1948_v55 = vpop.f32.mrf.mxu1 }
 0x604   :  { %v1545_v56 = vpop.f32.mrf.mxu1 }
 0x606   :  { %v548_v57 = vpop.f32.mrf.mxu1  ;;  %v1950_v58 = vpop.f32.mrf.mxu0 }
 0x607   :  { %v493_v57 = vsel %vm160_vm2, %v1922_v43, 0.0 }
 0x608   :  { %v1546_v59 = vpop.f32.mrf.mxu1  ;;  %v1551_v60 = vpop.f32.mrf.mxu0 }
 0x609   :  { %v496_v60 = vsel %vm160_vm2, %v1928_v48, 0.0 }
 0x60a   :  { %v596_v61 = vpop.f32.mrf.mxu0  ;;  %v662_v62 = vpop.f32.mrf.mxu1 }
 0x60b   :  { %v718_v63 = vsel %vm160_vm2, %v662_v62, -inf }
 0x60c   :  { %719 = vmax.xlane.f32.xlu0 %v718_v63  ;;  %v1552_v2 = vpop.f32.mrf.mxu0  ;;  %v1557_v4 = vpop.f32.mrf.mxu1 }
 0x60e   :  { %v665_v5 = vpop.f32.mrf.mxu1  ;;  %v712_v6 = vpop.f32.mrf.mxu0 }
 0x60f   :  { %v721_v8 = vsel %vm160_vm2, %v712_v6, -inf }
 0x610   :  { %v1558_v9 = vpop.f32.mrf.mxu1  ;;  %722 = vmax.xlane.f32.xlu1 %v721_v8  ;;  %v1563_v10 = vpop.f32.mrf.mxu0 }
 0x612   :  { %v715_v11 = vpop.f32.mrf.mxu0 }
 0x614   :  { %v1564_v12 = vpop.f32.mrf.mxu0 }
 0x615   :  { %v267_v12 = vsel %vm160_vm2, %v1880_v3, 0.0 }
 0x621   :  { %907 = vrot.lane.b32.xlu1 %v1851_v38, %s1734_s19 }
 0x622   :  { %740 = vrot.lane.b32.xlu0 %v1848_v35, %s1733_s18 }
 0x625   :  { %905 = vrot.lane.b32.xlu1 %v1851_v38, %s1735_s20 }
 0x626   :  { %857 = vrot.lane.b32.xlu0 %v1848_v35, %s1734_s19 }
 0x62a   :  { %855 = vrot.lane.b32.xlu0 %v1848_v35, %s1735_s20 }
 0x695   :  { %v720_v13 = vpop.xlane.xlu0 %719 }
 0x696   :  { %v724_v16 = vsub.f32 %v662_v62, %v720_v13 }
 0x698   :  { %v726_v17 = vmul.f32 1.442695, %v724_v16 }
 0x699   :  { %v741_v19 = vpop.permute.xlu0 %740  ;;  %v723_v20 = vpop.xlane.xlu1 %722 }
 0x69a   :  { %1670 = vpow2.f32 %v726_v17  ;;  %v746_v21 = vsel %vm282_vm3, %v741_v19, 0  ;;  %v725_v22 = vsub.f32 %v712_v6, %v723_v20  ;;  %v270_v17 = vsel %vm160_vm2, %v1886_v7, 0.0 }
 0x69b   :  { %1566 = vmatpush3.bf16.msra.mxu1 %v746_v21 }
 0x69c   :  { %v728_v23 = vmul.f32 1.442695, %v725_v22  ;;  %1577 = vmatprep.subr.bf16.mxu1 %v1724_v15 }
 0x69d   :  { %v858_v25 = vpop.permute.xlu0 %857  ;;  %v908_v29 = vpop.permute.xlu1 %907 }
 0x69e   :  { %1672 = vpow2.f32 %v728_v23  ;;  %v863_v27 = vsel %vm160_vm2, %v858_v25, 0  ;;  %v913_v31 = vsel %vm160_vm2, %v908_v29, 0 }
 0x6a1   :  { %v856_v32 = vpop.permute.xlu0 %855  ;;  %v906_v33 = vpop.permute.xlu1 %905 }
 0x6a7   :  { %v1671_v24 = vpop.eup %1670 }
 0x6a8   :  { %v738_v26 = vpack.c.bf16 %v1671_v24, %v1671_v24  ;;  %v730_v59 = vsel %vm160_vm2, %v1671_v24, 0.0 }
 0x6aa   :  { %1568 = vmatmul.mubr.msk.bf16.vlgmr.msra.gmra.mxu1 %vm160_vm2, %v738_v26 }
 0x6ab   :  { %v1673_v28 = vpop.eup %1672  ;;  %1578 = vmatpush3.bf16.xpose.msra.mxu1 %v863_v27  ;;  %1579 = vmatprep.mubr.msk.bf16.mxu1 %vm1725_vm1, %v1724_v15 }
 0x6ac   :  { %v739_v30 = vpack.c.bf16 %v1673_v28, %v1673_v28  ;;  %1589 = vmatprep.subr.bf16.mxu1 %v1724_v15  ;;  %v733_v61 = vsel %vm160_vm2, %v1673_v28, 0.0 }
 0x6ae   :  { %1574 = vmatmul.mubr.msk.bf16.vlgmr.msra.gmra.mxu0 %vm160_vm2, %v739_v30 }
 0x6af   :  { %1584 = vmatpush3.bf16.xpose.msra.mxu0 %v913_v31  ;;  %1585 = vmatprep.mubr.msk.bf16.mxu0 %vm1725_vm1, %v1724_v15 }
 0x6b0   :  { %1595 = vmatprep.subr.bf16.mxu0 %v1724_v15 }
 0x6b2   :  { %1580 = vmatmul.mubr.msk.bf16.vlgmr.msra.gmra.mxu1 %vm160_vm2, %v856_v32 }
 0x6b3   :  { %1591 = vmatprep.mubr.msk.bf16.mxu1 %vm1725_vm1, %v1724_v15 }
 0x6b6   :  { %1586 = vmatmul.mubr.msk.bf16.vlgmr.msra.gmra.mxu0 %vm160_vm2, %v906_v33 }
 0x6b7   :  { %1597 = vmatprep.mubr.msk.bf16.mxu0 %vm1725_vm1, %v1724_v15 }
 0x76a   :  { %v1978_v34 = vpop.f32.mrf.mxu1 }
 0x76c   :  { %v1569_v36 = vpop.f32.mrf.mxu1 }
 0x76e   :  { %v785_v37 = vpop.f32.mrf.mxu1  ;;  %v1980_v39 = vpop.f32.mrf.mxu0 }
 0x770   :  { %v1570_v40 = vpop.f32.mrf.mxu1  ;;  %v1575_v41 = vpop.f32.mrf.mxu0 }
 0x772   :  { %v833_v42 = vpop.f32.mrf.mxu0  ;;  %v899_v44 = vpop.f32.mrf.mxu1 }
 0x773   :  { %v955_v45 = vsel %vm160_vm2, %v899_v44, -inf }
 0x774   :  { %956 = vmax.xlane.f32.xlu0 %v955_v45  ;;  %v1576_v46 = vpop.f32.mrf.mxu0  ;;  %v1581_v47 = vpop.f32.mrf.mxu1 }
 0x776   :  { %v902_v49 = vpop.f32.mrf.mxu1  ;;  %v949_v50 = vpop.f32.mrf.mxu0 }
 0x777   :  { %v958_v51 = vsel %vm160_vm2, %v949_v50, -inf }
 0x778   :  { %v1582_v52 = vpop.f32.mrf.mxu1  ;;  %959 = vmax.xlane.f32.xlu1 %v958_v51  ;;  %v1587_v53 = vpop.f32.mrf.mxu0 }
 0x77a   :  { %v952_v54 = vpop.f32.mrf.mxu0 }
 0x77c   :  { %v1588_v56 = vpop.f32.mrf.mxu0 }
 0x789   :  { %1025 = vrot.lane.b32.xlu1 %v1851_v38, %s1736_s21 }
 0x78a   :  { %977 = vrot.lane.b32.xlu0 %v1848_v35, %s1736_s21 }
 0x7a9   :  { %494 = vadd.xlane.f32.xlu0 %v493_v57 }
 0x7ad   :  { %731 = vadd.xlane.f32.xlu0 %v730_v59  ;;  %497 = vadd.xlane.f32.xlu1 %v496_v60 }
 0x7b1   :  { %734 = vadd.xlane.f32.xlu0 %v733_v61 }
 0x7fd   :  { %v957_v62 = vpop.xlane.xlu0 %956 }
 0x7fe   :  { %v961_v63 = vsub.f32 %v899_v44, %v957_v62 }
 0x800   :  { %v963_v2 = vmul.f32 1.442695, %v961_v63 }
 0x801   :  { %v978_v38 = vpop.permute.xlu0 %977  ;;  %v960_v4 = vpop.xlane.xlu1 %959 }
 0x802   :  { %1674 = vpow2.f32 %v963_v2  ;;  %v983_v35 = vsel %vm282_vm3, %v978_v38, 0  ;;  %v962_v43 = vsub.f32 %v949_v50, %v960_v4 }
 0x803   :  { %1590 = vmatpush3.bf16.msra.mxu1 %v983_v35 }
 0x804   :  { %v965_v5 = vmul.f32 1.442695, %v962_v43  ;;  %1601 = vmatprep.subr.bf16.mxu1 %v1724_v15 }
 0x805   :  { %v1026_v6 = vpop.permute.xlu1 %1025 }
 0x806   :  { %1676 = vpow2.f32 %v965_v5  ;;  %v1031_v48 = vsel %vm282_vm3, %v1026_v6, 0  ;;  %v1430_v5 = vld [vmem:[%s2092_s5] ss:$0 sm:$0xff] }
 0x807   :  { %1596 = vmatpush3.bf16.msra.mxu0 %v1031_v48 }
 0x808   :  { %1609 = vmatprep.subr.bf16.mxu0 %v1724_v15 }
 0x80f   :  { %v1675_v8 = vpop.eup %1674 }
 0x810   :  { %v967_v9 = vsel %vm160_vm2, %v1675_v8, 0.0  ;;  %v975_v10 = vpack.c.bf16 %v1675_v8, %v1675_v8 }
 0x811   :  { %968 = vadd.xlane.f32.xlu0 %v967_v9 }
 0x812   :  { %1592 = vmatmul.mubr.msk.bf16.vlgmr.msra.gmra.mxu1 %vm160_vm2, %v975_v10 }
 0x813   :  { %v1677_v11 = vpop.eup %1676  ;;  %1605 = vmatprep.mubr.msk.bf16.mxu1 %vm1725_vm1, %v1724_v15 }
 0x814   :  { %v970_v13 = vsel %vm160_vm2, %v1677_v11, 0.0  ;;  %v976_v16 = vpack.c.bf16 %v1677_v11, %v1677_v11 }
 0x815   :  { %268 = vadd.xlane.f32.xlu0 %v267_v12  ;;  %971 = vadd.xlane.f32.xlu1 %v970_v13 }
 0x816   :  { %1598 = vmatmul.mubr.msk.bf16.vlgmr.msra.gmra.mxu0 %vm160_vm2, %v976_v16 }
 0x817   :  { %1613 = vmatprep.mubr.msk.bf16.mxu0 %vm1725_vm1, %v1724_v15 }
 0x819   :  { %271 = vadd.xlane.f32.xlu1 %v270_v17 }
 0x832   :  { %v495_v19 = vpop.xlane.xlu0 %494 }
 0x833   :  { %1678 = vrcp.f32 %v495_v19 }
 0x836   :  { %v732_v20 = vpop.xlane.xlu0 %731  ;;  %v498_v21 = vpop.xlane.xlu1 %497 }
 0x837   :  { %1680 = vrcp.f32 %v732_v20 }
 0x838   :  { %1682 = vrcp.f32 %v498_v21 }
 0x83a   :  { %v735_v3 = vpop.xlane.xlu0 %734 }
 0x83b   :  { %1684 = vrcp.f32 %v735_v3 }
 0x840   :  { %v1679_v22 = vpop.eup %1678 }
 0x841   :  { %v599_v23 = vmul.f32 %v1679_v22, %v1948_v55 }
 0x843   :  { %v1445_v24 = vpack.c.bf16 %v599_v23, %v599_v23 }
 0x844   :  { %v1681_v25 = vpop.eup %1680 }
 0x845   :  { %v1683_v26 = vpop.eup %1682  ;;  %609 = vrot.lane.b32.xlu0 %v1445_v24, %s1737_s22  ;;  %v836_v28 = vmul.f32 %v1681_v25, %v1978_v34  ;;  %v1652_v25 = vld [vmem:[%s2095_s8 + $0x8] sm:$0xff]  }
 0x846   :  { %v600_v7 = vmul.f32 %v1683_v26, %v1950_v58  ;;  %1610 = vmatpush3.bf16.msra.mxu0 %v1652_v25  ;;  %v1653_v26 = vld [vmem:[%s2095_s8] sm:$0xff]  }
 0x847   :  { %v1447_v30 = vpack.c.bf16 %v836_v28, %v836_v28  ;;  %1611 = vmatprep.subr.bf16.mxu0 %v1724_v15 }
 0x848   :  { %v1446_v27 = vpack.c.bf16 %v600_v7, %v600_v7  ;;  %v1685_v29 = vpop.eup %1684 }
 0x849   :  { %v837_v31 = vmul.f32 %v1685_v29, %v1980_v39 }
 0x84a   :  { %611 = vrot.lane.b32.xlu1 %v1446_v27, %s1737_s22  ;;  %1612 = vmatpush3.bf16.msra.mxu0 %v1653_v26 }
 0x84b   :  { %v1448_v55 = vpack.c.bf16 %v837_v31, %v837_v31 }
 0x84e   :  { %846 = vrot.lane.b32.xlu1 %v1447_v30, %s1738_s23 }
 0x852   :  { %848 = vrot.lane.b32.xlu1 %v1448_v55, %s1738_s23  ;;  %s1740_s23 = smov [#allocation3]  }
 0x853   :  { %s1386_s24 = sshll.u32 %s1740_s23, 4  ;;  %s1387_s24 = int_to_ptr.vmem [resolvable:$true] %s1386_s24 }
 0x854   :  { %s1702_s0 = scalar_lea.vmem %s1387_s24, 256  ;;  %p1707_p1 = scmp.lt.s32.totalorder %s1387_s24, %s1387_s24 }
 0x855   :  { %p1703_p0 = scmp.ne.s32.totalorder %s1387_s24, %s1702_s0  ;;  %p1708_p2 = scmp.lt.s32.totalorder %s1702_s0, %s1702_s0 }
 0x857   :  { %p1709_p3 = por %p1708_p2, %p1707_p1 }
 0x859   :  { %p1710_p4 = pnand %p1709_p3, %p1703_p0 }
 0x89a   :  { %v969_v32 = vpop.xlane.xlu0 %968 }
 0x89e   :  { %v269_v33 = vpop.xlane.xlu0 %268  ;;  %v972_v36 = vpop.xlane.xlu1 %971 }
 0x89f   :  { %1686 = vrcp.f32 %v269_v33  ;;  %v1431_v33 = vld [vmem:[%s2093_s6] ss:$0 sm:$0xff] }
 0x8a2   :  { %v272_v37 = vpop.xlane.xlu1 %271 }
 0x8a3   :  { %1688 = vrcp.f32 %v272_v37 }
 0x8a4   :  { %1690 = vrcp.f32 %v969_v32 }
 0x8a5   :  { %1692 = vrcp.f32 %v972_v36 }
 0x8ac   :  { %v1687_v58 = vpop.eup %1686 }
 0x8ad   :  { %v374_v40 = vmul.f32 %v1687_v58, %v1906_v14  ;;  %v1649_v14 = vld [vmem:[%s2091_s4 + $0x8] sm:$0xff]  }
 0x8ae   :  { %1602 = vmatpush3.bf16.msra.mxu1 %v1649_v14  ;;  %v1433_v14 = vld [vmem:[%s2096_s9] ss:$0 sm:$0xff] }
 0x8af   :  { %v376_v34 = vpack.c.bf16 %v374_v40, %v374_v40  ;;  %1603 = vmatprep.subr.bf16.mxu1 %v1724_v15  ;;  %v1432_v40 = vld [vmem:[%s2094_s7] ss:$0 sm:$0xff] }
 0x8b0   :  { %v1689_v41 = vpop.eup %1688 }
 0x8b1   :  { %379 = vst.msk [vmem:[#allocation2] sm:$0xf] %vm378_vm4, %v376_v34  ;;  %v375_v42 = vmul.f32 %v1689_v41, %v1908_v18  ;;  %v1650_v18 = vld [vmem:[%s2091_s4] sm:$0xff]   ;;  %v1691_v49 = vpop.eup %1690 }
 0x8b2   :  { %1604 = vmatpush3.bf16.msra.mxu1 %v1650_v18  ;;  %v1693_v54 = vpop.eup %1692 }
 0x8b3   :  { %v377_v39 = vpack.c.bf16 %v375_v42, %v375_v42  ;;  %1617 = vmatprep.subr.bf16.mxu1 %v1724_v15 }
 0x8b5   :  { %380 = vst.msk [vmem:[#allocation2 + $0x4] sm:$0xf] %vm378_vm4, %v377_v39 }
 0x8b7   :  { %v610_v44 = vpop.permute.xlu0 %609 }
 0x8b8   :  { %616 = vst.msk [vmem:[#allocation2] sm:$0xf] %vm615_vm5, %v610_v44  ;;  %v1654_v44 = vld [vmem:[%s2097_s10 + $0x18] sm:$0xff]  }
 0x8bc   :  { %v612_v45 = vpop.permute.xlu1 %611 }
 0x8bd   :  { %617 = vst.msk [vmem:[#allocation2 + $0x4] sm:$0xf] %vm615_vm5, %v612_v45  ;;  %v1655_v45 = vld [vmem:[%s2097_s10 + $0x10] sm:$0xff]  }
 0x8c0   :  { %v847_v46 = vpop.permute.xlu1 %846 }
 0x8c1   :  { %853 = vst.msk [vmem:[#allocation2] sm:$0xf] %vm852_vm6, %v847_v46  ;;  %v1656_v46 = vld [vmem:[%s2097_s10 + $0x8] sm:$0xff]  }
 0x8c4   :  { %v849_v47 = vpop.permute.xlu1 %848 }
 0x8c5   :  { %854 = vst.msk [vmem:[#allocation2 + $0x4] sm:$0xf] %vm852_vm6, %v849_v47  ;;  %v1657_v47 = vld [vmem:[%s2097_s10] sm:$0xff]  }
 0x8d2   :  { %v1019_v50 = vpop.f32.mrf.mxu1 }
 0x8d3   :  { %v1073_v51 = vmul.f32 %v1691_v49, %v1019_v50 }
 0x8d4   :  { %v1593_v52 = vpop.f32.mrf.mxu1 }
 0x8d5   :  { %v1449_v53 = vpack.c.bf16 %v1073_v51, %v1073_v51 }
 0x8d6   :  { %v1022_v56 = vpop.f32.mrf.mxu1  ;;  %v1067_v57 = vpop.f32.mrf.mxu0 }
 0x8d7   :  { %v1074_v59 = vmul.f32 %v1693_v54, %v1067_v57  ;;  %1083 = vrot.lane.b32.xlu0 %v1449_v53, %s1739_s27 }
 0x8d8   :  { %v1594_v60 = vpop.f32.mrf.mxu1  ;;  %v1599_v61 = vpop.f32.mrf.mxu0 }
 0x8d9   :  { %v1450_v62 = vpack.c.bf16 %v1074_v59, %v1074_v59 }
 0x8da   :  { %v1070_v63 = vpop.f32.mrf.mxu0 }
 0x8db   :  { %1085 = vrot.lane.b32.xlu1 %v1450_v62, %s1739_s27 }
 0x8dc   :  { %v1600_v2 = vpop.f32.mrf.mxu0 }
 0x949   :  { %v1084_v38 = vpop.permute.xlu0 %1083 }
 0x94a   :  { %1090 = vst.msk [vmem:[#allocation2] sm:$0xf] %vm1089_vm7, %v1084_v38 }
 0x94d   :  { %v1086_v4 = vpop.permute.xlu1 %1085 }
 0x94e   :  { %1091 = vst.msk [vmem:[#allocation2 + $0x4] sm:$0xf] %vm1089_vm7, %v1086_v4  ;;  %v1437_v4 = vld [vmem:[%s2098_s11] ss:$0 sm:$0xff] }
 0x955   :  { %v1651_v35 = vld [vmem:[#allocation2] sm:$0xff]  }
 0x956   :  { %1606 = vmatmul.mubr.msk.bf16.vlgmr.msra.gmra.mxu1 %vm47_vm0, %v1651_v35 }
 0x957   :  { %1625 = vmatprep.mubr.msk.bf16.mxu1 %vm1725_vm1, %v1724_v15  ;;  %1618 = vmatpush3.bf16.msra.mxu1 %v1654_v44 }
 0x958   :  { %1619 = vmatprep.subr.bf16.mxu1 %v1724_v15 }
 0x95b   :  { %1620 = vmatpush3.bf16.msra.mxu1 %v1655_v45 }
 0x95c   :  { %1621 = vmatprep.subr.bf16.mxu1 %v1724_v15 }
 0x95f   :  { %1622 = vmatpush3.bf16.msra.mxu1 %v1656_v46 }
 0x960   :  { %1623 = vmatprep.subr.bf16.mxu1 %v1724_v15 }
 0x963   :  { %1624 = vmatpush3.bf16.msra.mxu1 %v1657_v47 }
 0xa16   :  { %v1152_v43 = vpop.f32.mrf.mxu1 }
 0xa17   :  { %v1159_v6 = vadd.f32 %v1152_v43, %v1810_v0 }
 0xa18   :  { %v1607_v48 = vpop.f32.mrf.mxu1 }
 0xa19   :  { %v2031_v8 = vadd.f32 %v1430_v5, %v1159_v6 }
 0xa1a   :  { %v1155_v9 = vpop.f32.mrf.mxu1 }
 0xa1b   :  { %v1160_v10 = vadd.f32 %v1155_v9, %v1815_v1  ;;  %v1172_v11 = vsel %vm47_vm0, %v2031_v8, 0.0 }
 0xa1c   :  { %1173 = vadd.xlane.f32.xlu0 %v1172_v11  ;;  %v1608_v12 = vpop.f32.mrf.mxu1 }
 0xa1d   :  { %v2036_v13 = vadd.f32 %v1430_v5, %v1160_v10 }
 0xa1f   :  { %v1175_v16 = vsel %vm47_vm0, %v2036_v13, 0.0 }
 0xa20   :  { %1176 = vadd.xlane.f32.xlu1 %v1175_v16 }
 0xaa5   :  { %v1174_v17 = vpop.xlane.xlu0 %1173 }
 0xaa6   :  { %v1178_v19 = vmul.f32 0.03125, %v1174_v17 }
 0xaa8   :  { %v1180_v0 = vsub.f32 %v2031_v8, %v1178_v19 }
 0xaa9   :  { %v1177_v20 = vpop.xlane.xlu1 %1176 }
 0xaaa   :  { %v1179_v21 = vmul.f32 0.03125, %v1177_v20  ;;  %v1182_v3 = vmul.f32 %v1180_v0, %v1180_v0 }
 0xaac   :  { %v1181_v1 = vsub.f32 %v2036_v13, %v1179_v21  ;;  %v1184_v22 = vsel %vm47_vm0, %v1182_v3, 0.0 }
 0xaad   :  { %1185 = vadd.xlane.f32.xlu0 %v1184_v22 }
 0xaae   :  { %v1183_v23 = vmul.f32 %v1181_v1, %v1181_v1 }
 0xab0   :  { %v1187_v24 = vsel %vm47_vm0, %v1183_v23, 0.0 }
 0xab1   :  { %1188 = vadd.xlane.f32.xlu0 %v1187_v24 }
 0xb36   :  { %v1186_v7 = vpop.xlane.xlu0 %1185 }
 0xb37   :  { %v1190_v27 = vmul.f32 0.03125, %v1186_v7 }
 0xb39   :  { %v1192_v28 = vadd.f32 1e-05, %v1190_v27 }
 0xb3a   :  { %v1189_v29 = vpop.xlane.xlu0 %1188 }
 0xb3b   :  { %1694 = vrsqrt.f32 %v1192_v28  ;;  %v1191_v30 = vmul.f32 0.03125, %v1189_v29 }
 0xb3d   :  { %v1193_v31 = vadd.f32 1e-05, %v1191_v30 }
 0xb3f   :  { %1696 = vrsqrt.f32 %v1193_v31 }
 0xb48   :  { %v1695_v55 = vpop.eup %1694 }
 0xb49   :  { %v1196_v32 = vmul.f32 %v1695_v55, %v1180_v0 }
 0xb4b   :  { %v1204_v58 = vmul.f32 %v1431_v33, %v1196_v32 }
 0xb4c   :  { %v1697_v36 = vpop.eup %1696 }
 0xb4d   :  { %v1197_v37 = vmul.f32 %v1697_v36, %v1181_v1  ;;  %v1212_v41 = vadd.f32 %v1432_v40, %v1204_v58 }
 0xb4f   :  { %v1205_v34 = vmul.f32 %v1431_v33, %v1197_v37 }
 0xb51   :  { %v1213_v42 = vadd.f32 %v1432_v40, %v1205_v34 }
 0xb53   :  { %v1214_v39 = vpack.c.bf16 %v1213_v42, %v1212_v41 }
 0xb55   :  { %1614 = vmatmul.mubr.msk.bf16.vlgmr.msra.gmra.mxu0 %vm47_vm0, %v1214_v39 }
 0xc15   :  { %v1275_v18 = vpop.f32.mrf.mxu0 }
 0xc16   :  { %v1276_v49 = vadd.f32 %v1433_v14, %v1275_v18 }
 0xc17   :  { %v1615_v50 = vpop.f32.mrf.mxu0 }
 0xc18   :  { %v1284_v51 = vmul.f32 0.70710677, %v1276_v49  ;;  %v1282_v60 = vmul.f32 0.5, %v1276_v49 }
 0xc19   :  { %v1278_v52 = vpop.f32.mrf.mxu0 }
 0xc1a   :  { %1698 = verf.f32 %v1284_v51  ;;  %v1279_v53 = vadd.f32 %v1433_v14, %v1278_v52 }
 0xc1b   :  { %v1616_v54 = vpop.f32.mrf.mxu0 }
 0xc1c   :  { %v1285_v56 = vmul.f32 0.70710677, %v1279_v53  ;;  %v1283_v61 = vmul.f32 0.5, %v1279_v53 }
 0xc1e   :  { %1700 = verf.f32 %v1285_v56 }
 0xc27   :  { %v1699_v15 = vpop.eup %1698 }
 0xc28   :  { %v1288_v57 = vadd.f32 1.0, %v1699_v15 }
 0xc2a   :  { %v1290_v63 = vmul.f32 %v1288_v57, %v1282_v60 }
 0xc2b   :  { %v1701_v59 = vpop.eup %1700 }
 0xc2c   :  { %v1289_v62 = vadd.f32 1.0, %v1701_v59 }
 0xc2e   :  { %v1291_v2 = vmul.f32 %v1289_v62, %v1283_v61 }
 0xc30   :  { %v1292_v38 = vpack.c.bf16 %v1291_v2, %v1290_v63 }
 0xc32   :  { %1626 = vmatmul.mubr.msk.bf16.vlgmr.msra.gmra.mxu1 %vm1332_vm8, %v1292_v38 }
 0xcf2   :  { %v1370_v35 = vpop.f32.mrf.mxu1 }
 0xcf3   :  { %v1371_v43 = vadd.f32 %v1437_v4, %v1370_v35 }
 0xcf4   :  { %v1627_v5 = vpop.f32.mrf.mxu1 }
 0xcf5   :  { %v1377_v6 = vadd.f32 %v1371_v43, %v2031_v8 }
 0xcf6   :  { %v1373_v48 = vpop.f32.mrf.mxu1 }
 0xcf7   :  { %1379 = vst.msk [vmem:[#allocation3] sm:$0xff] %vm47_vm0, %v1377_v6  ;;  %v1374_v9 = vadd.f32 %v1437_v4, %v1373_v48 }
 0xcf8   :  { %v1628_v10 = vpop.f32.mrf.mxu1 }
 0xcf9   :  { %v1378_v11 = vadd.f32 %v1374_v9, %v2036_v13 }
 0xcfb   :  { %1380 = vst.msk [vmem:[#allocation3 + $0x8] sm:$0xff] %vm47_vm0, %v1378_v11 }
 0xcfc   :  { %1713 = shalt.err (!%p1710_p4)
}
 0xcfd   :  { %s1741_s11 = smov 128  }
 0xcfe   :  { %1392 = dma.vmem_to_hbm [thread:$0]  %s1387_s24, 256, %s2099_s12, [#allocation4], %s1741_s11, %s1741_s11, %s1737_s22  }
 0xcff   :  { %1722 = dma.done.wait [#allocation4], 256  }
 0xd00   :  { %1723 = vsyncadd [#allocation4], 4294967040 }
 0xd01   :  { %1396 = vsyncpa [#allocation4], 1 }

</bundles_post_ra>
